<compile_context>
chip_gen: v6e
topology: v6e:2x2x1
jax: 0.10.0
libtpu: 0.0.40
codegen_flags: <defaults>
</compile_context>

<pallas_src>
import math

import jax
import jax.numpy as jnp
from jax.experimental import pallas as pl
from jax.experimental.pallas import tpu as pltpu


# ----------------------------- fused decoder-layer kernel -----------------------------

def make_decoder_layer_kernel(nhead, d_model):
    hd = d_model // nhead

    def kernel(tgt_ref, mem_ref,
               w_qkv, b_qkv, wo1, bo1, g1, be1,                 # self-attn block
               w_q, b_q, w_kv, b_kv, wo2, bo2, g2, be2,          # cross-attn block
               w1, b1, w2, b2, g3, be3,                          # FFN block
               o_ref):

        def mha(q, k, v):
            # q:(T,d) already scaled (scale folded into weights), k,v:(S,d)
            outs = []
            for h in range(nhead):                               # static unroll over heads
                lo, hi = h * hd, (h + 1) * hd
                qh, kh, vh = q[:, lo:hi], k[:, lo:hi], v[:, lo:hi]
                s = jnp.einsum("td,sd->ts", qh, kh,
                               preferred_element_type=jnp.float32)
                s = s - jnp.max(s, axis=-1, keepdims=True)
                p = jnp.exp(s)
                o = jnp.einsum("ts,sd->td", p, vh,
                               preferred_element_type=jnp.float32)
                outs.append(o / jnp.sum(p, axis=-1, keepdims=True))   # exact softmax normalization
            return jnp.concatenate(outs, axis=-1)                # (T, d) lane-dense

        def layernorm(z, g_ref, b_ref):
            mean = jnp.mean(z, axis=-1, keepdims=True)
            zc = z - mean
            var = jnp.mean(zc * zc, axis=-1, keepdims=True)
            return zc * jax.lax.rsqrt(var + 1e-5) * g_ref[...] + b_ref[...]

        x = tgt_ref[...]                                         # (T, d)
        mem = mem_ref[...]                                       # (S, d)

        # --- self-attention + residual + LayerNorm1 (fused QKV matmul) ---
        qkv = jnp.dot(x, w_qkv[...], preferred_element_type=jnp.float32) + b_qkv[...]
        a = mha(qkv[:, :d_model], qkv[:, d_model:2 * d_model], qkv[:, 2 * d_model:])
        x = layernorm(x + jnp.dot(a, wo1[...], preferred_element_type=jnp.float32) + bo1[...],
                      g1, be1)

        # --- cross-attention + residual + LayerNorm2 (fused KV matmul) ---
        qc = jnp.dot(x, w_q[...], preferred_element_type=jnp.float32) + b_q[...]
        kv = jnp.dot(mem, w_kv[...], preferred_element_type=jnp.float32) + b_kv[...]
        a2 = mha(qc, kv[:, :d_model], kv[:, d_model:])
        x = layernorm(x + jnp.dot(a2, wo2[...], preferred_element_type=jnp.float32) + bo2[...],
                      g2, be2)

        # --- FFN (linear1 -> ReLU -> linear2) + residual + LayerNorm3 ---
        h_act = jnp.maximum(jnp.dot(x, w1[...], preferred_element_type=jnp.float32) + b1[...], 0.0)
        z = x + jnp.dot(h_act, w2[...], preferred_element_type=jnp.float32) + b2[...]
        o_ref[...] = layernorm(z, g3, be3)

    return kernel


# ----------------------------- wrapper -----------------------------

def _resident(shape):
    """Full-array BlockSpec with constant index_map -> stays VMEM-resident across the grid."""
    return pl.BlockSpec(shape, lambda b, _n=len(shape): (0,) * _n)


def transformer_decoder_layer(target, memory, p, nhead):
    """target:(T,B,d), memory:(S,B,d). One fused pallas_call per layer, grid over batch."""
    T, B, d = target.shape
    S = memory.shape[0]
    ff = p["w1"].shape[1]

    # lane-dense (B, T, d) / (B, S, d) kernel-boundary layout; batch becomes the grid axis
    tgt_b = jnp.transpose(target, (1, 0, 2))
    mem_b = jnp.transpose(memory, (1, 0, 2))

    out = pl.pallas_call(
        make_decoder_layer_kernel(nhead, d),
        grid=(B,),
        out_shape=jax.ShapeDtypeStruct((B, T, d), jnp.float32),
        in_specs=[
            pl.BlockSpec((None, T, d), lambda b: (b, 0, 0)),     # target slab for this batch
            pl.BlockSpec((None, S, d), lambda b: (b, 0, 0)),     # memory slab for this batch
            # self-attn block
            _resident((d, 3 * d)), _resident((1, 3 * d)),
            _resident((d, d)), _resident((1, d)), _resident((1, d)), _resident((1, d)),
            # cross-attn block
            _resident((d, d)), _resident((1, d)),
            _resident((d, 2 * d)), _resident((1, 2 * d)),
            _resident((d, d)), _resident((1, d)), _resident((1, d)), _resident((1, d)),
            # FFN block
            _resident((d, ff)), _resident((1, ff)),
            _resident((ff, d)), _resident((1, d)), _resident((1, d)), _resident((1, d)),
        ],
        out_specs=pl.BlockSpec((None, T, d), lambda b: (b, 0, 0)),
        compiler_params=pltpu.CompilerParams(dimension_semantics=("parallel",)),
    )(tgt_b, mem_b,
      p["w_qkv"], p["b_qkv"], p["wo1"], p["bo1"], p["g1"], p["be1"],
      p["w_q"], p["b_q"], p["w_kv"], p["b_kv"], p["wo2"], p["bo2"], p["g2"], p["be2"],
      p["w1"], p["b1"], p["w2"], p["b2"], p["g3"], p["be3"])

    return jnp.transpose(out, (1, 0, 2))                          # back to (T, B, d)


# ----------------------------- one-time weight preparation -----------------------------

def prepare_params(raw, d_model, nhead):
    """Load-time prep: transpose every PyTorch (out,in) weight to (in,out), fuse QKV / KV
    projections, fold the 1/sqrt(head_dim) softmax scale into the Q weights/bias, and
    pre-reshape all biases / LN params to (1, N). Forward path then does zero layout work."""
    d = d_model
    scale = 1.0 / math.sqrt(d // nhead)

    sa_w, sa_b = raw["sa_in_w"], raw["sa_in_b"]
    ca_w, ca_b = raw["ca_in_w"], raw["ca_in_b"]

    w_qkv = jnp.concatenate([sa_w[:d].T * scale, sa_w[d:2 * d].T, sa_w[2 * d:].T], axis=1)
    b_qkv = jnp.concatenate([sa_b[:d] * scale, sa_b[d:]], axis=0).reshape(1, 3 * d)

    return {
        # self-attention + LN1
        "w_qkv": w_qkv, "b_qkv": b_qkv,
        "wo1": raw["sa_out_w"].T, "bo1": raw["sa_out_b"].reshape(1, d),
        "g1": raw["ln1_g"].reshape(1, d), "be1": raw["ln1_b"].reshape(1, d),
        # cross-attention + LN2
        "w_q": ca_w[:d].T * scale, "b_q": (ca_b[:d] * scale).reshape(1, d),
        "w_kv": ca_w[d:].T, "b_kv": ca_b[d:].reshape(1, 2 * d),
        "wo2": raw["ca_out_w"].T, "bo2": raw["ca_out_b"].reshape(1, d),
        "g2": raw["ln2_g"].reshape(1, d), "be2": raw["ln2_b"].reshape(1, d),
        # FFN + LN3
        "w1": raw["l1_w"].T, "b1": raw["l1_b"].reshape(1, -1),
        "w2": raw["l2_w"].T, "b2": raw["l2_b"].reshape(1, d),
        "g3": raw["ln3_g"].reshape(1, d), "be3": raw["ln3_b"].reshape(1, d),
    }


# ----------------------------- pure-JAX reference (PyTorch semantics) -----------------------------

def _ref_mha(q_in, k_in, v_in, in_w, in_b, out_w, out_b, nhead):
    T, B, d = q_in.shape
    S = k_in.shape[0]
    hd = d // nhead
    wq, wk, wv = in_w[:d], in_w[d:2 * d], in_w[2 * d:]
    bq, bk, bv = in_b[:d], in_b[d:2 * d], in_b[2 * d:]
    q = (q_in.reshape(T * B, d) @ wq.T + bq).reshape(T, B * nhead, hd).transpose(1, 0, 2)
    k = (k_in.reshape(S * B, d) @ wk.T + bk).reshape(S, B * nhead, hd).transpose(1, 0, 2)
    v = (v_in.reshape(S * B, d) @ wv.T + bv).reshape(S, B * nhead, hd).transpose(1, 0, 2)
    s = jnp.einsum("btd,bsd->bts", q, k) / math.sqrt(hd)
    p = jax.nn.softmax(s, axis=-1)
    o = jnp.einsum("bts,bsd->btd", p, v)
    o = o.transpose(1, 0, 2).reshape(T * B, d)
    return (o @ out_w.T + out_b).reshape(T, B, d)


def _ref_ln(z, g, b):
    mean = jnp.mean(z, axis=-1, keepdims=True)
    var = jnp.mean((z - mean) ** 2, axis=-1, keepdims=True)
    return (z - mean) / jnp.sqrt(var + 1e-5) * g + b


def _ref_layer(target, memory, raw, nhead):
    x = _ref_ln(target + _ref_mha(target, target, target, raw["sa_in_w"], raw["sa_in_b"],
                                  raw["sa_out_w"], raw["sa_out_b"], nhead),
                raw["ln1_g"], raw["ln1_b"])
    x = _ref_ln(x + _ref_mha(x, memory, memory, raw["ca_in_w"], raw["ca_in_b"],
                             raw["ca_out_w"], raw["ca_out_b"], nhead),
                raw["ln2_g"], raw["ln2_b"])
    h = jnp.maximum(x @ raw["l1_w"].T + raw["l1_b"], 0.0) @ raw["l2_w"].T + raw["l2_b"]
    return _ref_ln(x + h, raw["ln3_g"], raw["ln3_b"])


# ----------------------------- main -----------------------------

if __name__ == "__main__":
    T, S, B = 8, 16, 2                 # target seq, memory seq, batch
    d_model, nhead, dim_ff = 128, 4, 256

    key = jax.random.PRNGKey(0)
    ks = jax.random.split(key, 20)

    def rnd(k, shape, scale=0.05):
        return jax.random.normal(k, shape, jnp.float32) * scale

    # raw parameters in PyTorch storage layout ((out, in) weights, in_proj stacked [q;k;v])
    raw = {
        "sa_in_w": rnd(ks[0], (3 * d_model, d_model)),
        "sa_in_b": rnd(ks[1], (3 * d_model,)),
        "sa_out_w": rnd(ks[2], (d_model, d_model)),
        "sa_out_b": rnd(ks[3], (d_model,)),
        "ca_in_w": rnd(ks[4], (3 * d_model, d_model)),
        "ca_in_b": rnd(ks[5], (3 * d_model,)),
        "ca_out_w": rnd(ks[6], (d_model, d_model)),
        "ca_out_b": rnd(ks[7], (d_model,)),
        "l1_w": rnd(ks[8], (dim_ff, d_model)),
        "l1_b": rnd(ks[9], (dim_ff,)),
        "l2_w": rnd(ks[10], (d_model, dim_ff)),
        "l2_b": rnd(ks[11], (d_model,)),
        "ln1_g": 1.0 + rnd(ks[14], (d_model,)),
        "ln1_b": rnd(ks[15], (d_model,)),
        "ln2_g": 1.0 + rnd(ks[16], (d_model,)),
        "ln2_b": rnd(ks[17], (d_model,)),
        "ln3_g": 1.0 + rnd(ks[18], (d_model,)),
        "ln3_b": rnd(ks[19], (d_model,)),
    }

    target = jax.random.normal(ks[12], (T, B, d_model), jnp.float32)
    memory = jax.random.normal(ks[13], (S, B, d_model), jnp.float32)

    params = prepare_params(raw, d_model, nhead)   # one-time weight layout / scale-folding prep

    fwd = jax.jit(transformer_decoder_layer, static_argnames=("nhead",))
    out = fwd(target, memory, params, nhead=nhead)
    out = jax.block_until_ready(out)

    ref = _ref_layer(target, memory, raw, nhead)
    assert out.shape == (T, B, d_model)
    assert jnp.allclose(out, ref, atol=2e-3, rtol=2e-3), "mismatch vs pure-JAX reference"

    print("KERNEL_OK")
</pallas_src>

<mosaic_0001>
module attributes {stable_mosaic.version = 11 : i64} {
  func.func @kernel(%arg0: i32, %arg1: memref<1x8x128xf32, #tpu.memory_space<vmem>>, %arg2: memref<1x16x128xf32, #tpu.memory_space<vmem>>, %arg3: memref<128x384xf32, #tpu.memory_space<vmem>>, %arg4: memref<1x384xf32, #tpu.memory_space<vmem>>, %arg5: memref<128x128xf32, #tpu.memory_space<vmem>>, %arg6: memref<1x128xf32, #tpu.memory_space<vmem>>, %arg7: memref<1x128xf32, #tpu.memory_space<vmem>>, %arg8: memref<1x128xf32, #tpu.memory_space<vmem>>, %arg9: memref<128x128xf32, #tpu.memory_space<vmem>>, %arg10: memref<1x128xf32, #tpu.memory_space<vmem>>, %arg11: memref<128x256xf32, #tpu.memory_space<vmem>>, %arg12: memref<1x256xf32, #tpu.memory_space<vmem>>, %arg13: memref<128x128xf32, #tpu.memory_space<vmem>>, %arg14: memref<1x128xf32, #tpu.memory_space<vmem>>, %arg15: memref<1x128xf32, #tpu.memory_space<vmem>>, %arg16: memref<1x128xf32, #tpu.memory_space<vmem>>, %arg17: memref<128x256xf32, #tpu.memory_space<vmem>>, %arg18: memref<1x256xf32, #tpu.memory_space<vmem>>, %arg19: memref<256x128xf32, #tpu.memory_space<vmem>>, %arg20: memref<1x128xf32, #tpu.memory_space<vmem>>, %arg21: memref<1x128xf32, #tpu.memory_space<vmem>>, %arg22: memref<1x128xf32, #tpu.memory_space<vmem>>, %arg23: memref<1x8x128xf32, #tpu.memory_space<vmem>>) attributes {dimension_semantics = [#tpu.dimension_semantics<parallel>], iteration_bounds = array<i64: 2>, scalar_prefetch = 0 : i64, scratch_operands = 0 : i64, tpu.core_type = #tpu.core_type<tc>, window_params = [{transform_indices = @transform_0, window_bounds = array<i64: 1, 8, 128>}, {transform_indices = @transform_1, window_bounds = array<i64: 1, 16, 128>}, {pipeline_mode = #tpu.pipeline_mode<synchronous>, transform_indices = @transform_2, window_bounds = array<i64: 128, 384>}, {pipeline_mode = #tpu.pipeline_mode<synchronous>, transform_indices = @transform_3, window_bounds = array<i64: 1, 384>}, {pipeline_mode = #tpu.pipeline_mode<synchronous>, transform_indices = @transform_4, window_bounds = array<i64: 128, 128>}, {pipeline_mode = #tpu.pipeline_mode<synchronous>, transform_indices = @transform_5, window_bounds = array<i64: 1, 128>}, {pipeline_mode = #tpu.pipeline_mode<synchronous>, transform_indices = @transform_6, window_bounds = array<i64: 1, 128>}, {pipeline_mode = #tpu.pipeline_mode<synchronous>, transform_indices = @transform_7, window_bounds = array<i64: 1, 128>}, {pipeline_mode = #tpu.pipeline_mode<synchronous>, transform_indices = @transform_8, window_bounds = array<i64: 128, 128>}, {pipeline_mode = #tpu.pipeline_mode<synchronous>, transform_indices = @transform_9, window_bounds = array<i64: 1, 128>}, {pipeline_mode = #tpu.pipeline_mode<synchronous>, transform_indices = @transform_10, window_bounds = array<i64: 128, 256>}, {pipeline_mode = #tpu.pipeline_mode<synchronous>, transform_indices = @transform_11, window_bounds = array<i64: 1, 256>}, {pipeline_mode = #tpu.pipeline_mode<synchronous>, transform_indices = @transform_12, window_bounds = array<i64: 128, 128>}, {pipeline_mode = #tpu.pipeline_mode<synchronous>, transform_indices = @transform_13, window_bounds = array<i64: 1, 128>}, {pipeline_mode = #tpu.pipeline_mode<synchronous>, transform_indices = @transform_14, window_bounds = array<i64: 1, 128>}, {pipeline_mode = #tpu.pipeline_mode<synchronous>, transform_indices = @transform_15, window_bounds = array<i64: 1, 128>}, {pipeline_mode = #tpu.pipeline_mode<synchronous>, transform_indices = @transform_16, window_bounds = array<i64: 128, 256>}, {pipeline_mode = #tpu.pipeline_mode<synchronous>, transform_indices = @transform_17, window_bounds = array<i64: 1, 256>}, {pipeline_mode = #tpu.pipeline_mode<synchronous>, transform_indices = @transform_18, window_bounds = array<i64: 256, 128>}, {pipeline_mode = #tpu.pipeline_mode<synchronous>, transform_indices = @transform_19, window_bounds = array<i64: 1, 128>}, {pipeline_mode = #tpu.pipeline_mode<synchronous>, transform_indices = @transform_20, window_bounds = array<i64: 1, 128>}, {pipeline_mode = #tpu.pipeline_mode<synchronous>, transform_indices = @transform_21, window_bounds = array<i64: 1, 128>}, {transform_indices = @transform_22, window_bounds = array<i64: 1, 8, 128>}]} {
    %c0 = arith.constant 0 : index
    %c0_0 = arith.constant 0 : index
    %c0_1 = arith.constant 0 : index
    %0 = vector.load %arg1[%c0, %c0_0, %c0_1] : memref<1x8x128xf32, #tpu.memory_space<vmem>>, vector<1x8x128xf32>
    %1 = vector.shape_cast %0 : vector<1x8x128xf32> to vector<8x128xf32>
    %c0_2 = arith.constant 0 : index
    %c0_3 = arith.constant 0 : index
    %c0_4 = arith.constant 0 : index
    %2 = vector.load %arg2[%c0_2, %c0_3, %c0_4] : memref<1x16x128xf32, #tpu.memory_space<vmem>>, vector<1x16x128xf32>
    %3 = vector.shape_cast %2 : vector<1x16x128xf32> to vector<16x128xf32>
    %c0_5 = arith.constant 0 : index
    %c0_6 = arith.constant 0 : index
    %4 = vector.load %arg3[%c0_5, %c0_6] : memref<128x384xf32, #tpu.memory_space<vmem>>, vector<128x384xf32>
    %cst = arith.constant dense<0.000000e+00> : vector<8x384xf32>
    %5 = tpu.matmul %1, %4, %cst {dimension_numbers = #tpu.dot_dimension_numbers<[1], [0], [0], [1], [0, 0, 1, 1], [], []>} : vector<8x128xf32>, vector<128x384xf32>, vector<8x384xf32> -> vector<8x384xf32>
    %c0_7 = arith.constant 0 : index
    %c0_8 = arith.constant 0 : index
    %6 = vector.load %arg4[%c0_7, %c0_8] : memref<1x384xf32, #tpu.memory_space<vmem>>, vector<1x384xf32>
    %7 = vector.broadcast %6 : vector<1x384xf32> to vector<8x384xf32>
    %8 = arith.addf %5, %7 : vector<8x384xf32>
    %9 = vector.extract_strided_slice %8 {offsets = [0, 0], sizes = [8, 128], strides = [1, 1]} : vector<8x384xf32> to vector<8x128xf32>
    %10 = vector.extract_strided_slice %8 {offsets = [0, 128], sizes = [8, 128], strides = [1, 1]} : vector<8x384xf32> to vector<8x128xf32>
    %11 = vector.extract_strided_slice %8 {offsets = [0, 256], sizes = [8, 128], strides = [1, 1]} : vector<8x384xf32> to vector<8x128xf32>
    %12 = vector.extract_strided_slice %9 {offsets = [0, 0], sizes = [8, 32], strides = [1, 1]} : vector<8x128xf32> to vector<8x32xf32>
    %13 = vector.extract_strided_slice %10 {offsets = [0, 0], sizes = [8, 32], strides = [1, 1]} : vector<8x128xf32> to vector<8x32xf32>
    %14 = vector.extract_strided_slice %11 {offsets = [0, 0], sizes = [8, 32], strides = [1, 1]} : vector<8x128xf32> to vector<8x32xf32>
    "tpu.trace_start"() <{level = 10 : i32, message = "td,sd->ts"}> : () -> ()
    %cst_9 = arith.constant dense<0.000000e+00> : vector<8x8xf32>
    %15 = tpu.matmul %12, %13, %cst_9 {dimension_numbers = #tpu.dot_dimension_numbers<[1], [1], [0], [0], [0, 0, 1, 0], [], []>} : vector<8x32xf32>, vector<8x32xf32>, vector<8x8xf32> -> vector<8x8xf32>
    "tpu.trace_stop"() : () -> ()
    %cst_10 = arith.constant dense<0xFF800000> : vector<8xf32>
    %16 = vector.multi_reduction <maximumf>, %15, %cst_10 [1] : vector<8x8xf32> to vector<8xf32>
    %17 = vector.shape_cast %16 : vector<8xf32> to vector<8x1xf32>
    %18 = vector.broadcast %17 : vector<8x1xf32> to vector<8x8xf32>
    %19 = arith.subf %15, %18 : vector<8x8xf32>
    %20 = math.exp %19 : vector<8x8xf32>
    "tpu.trace_start"() <{level = 10 : i32, message = "ts,sd->td"}> : () -> ()
    %cst_11 = arith.constant dense<0.000000e+00> : vector<8x32xf32>
    %21 = tpu.matmul %20, %14, %cst_11 {dimension_numbers = #tpu.dot_dimension_numbers<[1], [0], [0], [1], [0, 0, 1, 1], [], []>} : vector<8x8xf32>, vector<8x32xf32>, vector<8x32xf32> -> vector<8x32xf32>
    "tpu.trace_stop"() : () -> ()
    %cst_12 = arith.constant dense<0.000000e+00> : vector<8xf32>
    %22 = vector.multi_reduction <add>, %20, %cst_12 [1] : vector<8x8xf32> to vector<8xf32>
    %23 = vector.shape_cast %22 : vector<8xf32> to vector<8x1xf32>
    %24 = vector.broadcast %23 : vector<8x1xf32> to vector<8x32xf32>
    %25 = arith.divf %21, %24 : vector<8x32xf32>
    %26 = vector.extract_strided_slice %9 {offsets = [0, 32], sizes = [8, 32], strides = [1, 1]} : vector<8x128xf32> to vector<8x32xf32>
    %27 = vector.extract_strided_slice %10 {offsets = [0, 32], sizes = [8, 32], strides = [1, 1]} : vector<8x128xf32> to vector<8x32xf32>
    %28 = vector.extract_strided_slice %11 {offsets = [0, 32], sizes = [8, 32], strides = [1, 1]} : vector<8x128xf32> to vector<8x32xf32>
    "tpu.trace_start"() <{level = 10 : i32, message = "td,sd->ts"}> : () -> ()
    %cst_13 = arith.constant dense<0.000000e+00> : vector<8x8xf32>
    %29 = tpu.matmul %26, %27, %cst_13 {dimension_numbers = #tpu.dot_dimension_numbers<[1], [1], [0], [0], [0, 0, 1, 0], [], []>} : vector<8x32xf32>, vector<8x32xf32>, vector<8x8xf32> -> vector<8x8xf32>
    "tpu.trace_stop"() : () -> ()
    %cst_14 = arith.constant dense<0xFF800000> : vector<8xf32>
    %30 = vector.multi_reduction <maximumf>, %29, %cst_14 [1] : vector<8x8xf32> to vector<8xf32>
    %31 = vector.shape_cast %30 : vector<8xf32> to vector<8x1xf32>
    %32 = vector.broadcast %31 : vector<8x1xf32> to vector<8x8xf32>
    %33 = arith.subf %29, %32 : vector<8x8xf32>
    %34 = math.exp %33 : vector<8x8xf32>
    "tpu.trace_start"() <{level = 10 : i32, message = "ts,sd->td"}> : () -> ()
    %cst_15 = arith.constant dense<0.000000e+00> : vector<8x32xf32>
    %35 = tpu.matmul %34, %28, %cst_15 {dimension_numbers = #tpu.dot_dimension_numbers<[1], [0], [0], [1], [0, 0, 1, 1], [], []>} : vector<8x8xf32>, vector<8x32xf32>, vector<8x32xf32> -> vector<8x32xf32>
    "tpu.trace_stop"() : () -> ()
    %cst_16 = arith.constant dense<0.000000e+00> : vector<8xf32>
    %36 = vector.multi_reduction <add>, %34, %cst_16 [1] : vector<8x8xf32> to vector<8xf32>
    %37 = vector.shape_cast %36 : vector<8xf32> to vector<8x1xf32>
    %38 = vector.broadcast %37 : vector<8x1xf32> to vector<8x32xf32>
    %39 = arith.divf %35, %38 : vector<8x32xf32>
    %40 = vector.extract_strided_slice %9 {offsets = [0, 64], sizes = [8, 32], strides = [1, 1]} : vector<8x128xf32> to vector<8x32xf32>
    %41 = vector.extract_strided_slice %10 {offsets = [0, 64], sizes = [8, 32], strides = [1, 1]} : vector<8x128xf32> to vector<8x32xf32>
    %42 = vector.extract_strided_slice %11 {offsets = [0, 64], sizes = [8, 32], strides = [1, 1]} : vector<8x128xf32> to vector<8x32xf32>
    "tpu.trace_start"() <{level = 10 : i32, message = "td,sd->ts"}> : () -> ()
    %cst_17 = arith.constant dense<0.000000e+00> : vector<8x8xf32>
    %43 = tpu.matmul %40, %41, %cst_17 {dimension_numbers = #tpu.dot_dimension_numbers<[1], [1], [0], [0], [0, 0, 1, 0], [], []>} : vector<8x32xf32>, vector<8x32xf32>, vector<8x8xf32> -> vector<8x8xf32>
    "tpu.trace_stop"() : () -> ()
    %cst_18 = arith.constant dense<0xFF800000> : vector<8xf32>
    %44 = vector.multi_reduction <maximumf>, %43, %cst_18 [1] : vector<8x8xf32> to vector<8xf32>
    %45 = vector.shape_cast %44 : vector<8xf32> to vector<8x1xf32>
    %46 = vector.broadcast %45 : vector<8x1xf32> to vector<8x8xf32>
    %47 = arith.subf %43, %46 : vector<8x8xf32>
    %48 = math.exp %47 : vector<8x8xf32>
    "tpu.trace_start"() <{level = 10 : i32, message = "ts,sd->td"}> : () -> ()
    %cst_19 = arith.constant dense<0.000000e+00> : vector<8x32xf32>
    %49 = tpu.matmul %48, %42, %cst_19 {dimension_numbers = #tpu.dot_dimension_numbers<[1], [0], [0], [1], [0, 0, 1, 1], [], []>} : vector<8x8xf32>, vector<8x32xf32>, vector<8x32xf32> -> vector<8x32xf32>
    "tpu.trace_stop"() : () -> ()
    %cst_20 = arith.constant dense<0.000000e+00> : vector<8xf32>
    %50 = vector.multi_reduction <add>, %48, %cst_20 [1] : vector<8x8xf32> to vector<8xf32>
    %51 = vector.shape_cast %50 : vector<8xf32> to vector<8x1xf32>
    %52 = vector.broadcast %51 : vector<8x1xf32> to vector<8x32xf32>
    %53 = arith.divf %49, %52 : vector<8x32xf32>
    %54 = vector.extract_strided_slice %9 {offsets = [0, 96], sizes = [8, 32], strides = [1, 1]} : vector<8x128xf32> to vector<8x32xf32>
    %55 = vector.extract_strided_slice %10 {offsets = [0, 96], sizes = [8, 32], strides = [1, 1]} : vector<8x128xf32> to vector<8x32xf32>
    %56 = vector.extract_strided_slice %11 {offsets = [0, 96], sizes = [8, 32], strides = [1, 1]} : vector<8x128xf32> to vector<8x32xf32>
    "tpu.trace_start"() <{level = 10 : i32, message = "td,sd->ts"}> : () -> ()
    %cst_21 = arith.constant dense<0.000000e+00> : vector<8x8xf32>
    %57 = tpu.matmul %54, %55, %cst_21 {dimension_numbers = #tpu.dot_dimension_numbers<[1], [1], [0], [0], [0, 0, 1, 0], [], []>} : vector<8x32xf32>, vector<8x32xf32>, vector<8x8xf32> -> vector<8x8xf32>
    "tpu.trace_stop"() : () -> ()
    %cst_22 = arith.constant dense<0xFF800000> : vector<8xf32>
    %58 = vector.multi_reduction <maximumf>, %57, %cst_22 [1] : vector<8x8xf32> to vector<8xf32>
    %59 = vector.shape_cast %58 : vector<8xf32> to vector<8x1xf32>
    %60 = vector.broadcast %59 : vector<8x1xf32> to vector<8x8xf32>
    %61 = arith.subf %57, %60 : vector<8x8xf32>
    %62 = math.exp %61 : vector<8x8xf32>
    "tpu.trace_start"() <{level = 10 : i32, message = "ts,sd->td"}> : () -> ()
    %cst_23 = arith.constant dense<0.000000e+00> : vector<8x32xf32>
    %63 = tpu.matmul %62, %56, %cst_23 {dimension_numbers = #tpu.dot_dimension_numbers<[1], [0], [0], [1], [0, 0, 1, 1], [], []>} : vector<8x8xf32>, vector<8x32xf32>, vector<8x32xf32> -> vector<8x32xf32>
    "tpu.trace_stop"() : () -> ()
    %cst_24 = arith.constant dense<0.000000e+00> : vector<8xf32>
    %64 = vector.multi_reduction <add>, %62, %cst_24 [1] : vector<8x8xf32> to vector<8xf32>
    %65 = vector.shape_cast %64 : vector<8xf32> to vector<8x1xf32>
    %66 = vector.broadcast %65 : vector<8x1xf32> to vector<8x32xf32>
    %67 = arith.divf %63, %66 : vector<8x32xf32>
    %68 = tpu.concatenate %25, %39, %53, %67 in 1 : vector<8x32xf32>, vector<8x32xf32>, vector<8x32xf32>, vector<8x32xf32> -> vector<8x128xf32>
    %c0_25 = arith.constant 0 : index
    %c0_26 = arith.constant 0 : index
    %69 = vector.load %arg5[%c0_25, %c0_26] : memref<128x128xf32, #tpu.memory_space<vmem>>, vector<128x128xf32>
    %cst_27 = arith.constant dense<0.000000e+00> : vector<8x128xf32>
    %70 = tpu.matmul %68, %69, %cst_27 {dimension_numbers = #tpu.dot_dimension_numbers<[1], [0], [0], [1], [0, 0, 1, 1], [], []>} : vector<8x128xf32>, vector<128x128xf32>, vector<8x128xf32> -> vector<8x128xf32>
    %71 = arith.addf %1, %70 : vector<8x128xf32>
    %c0_28 = arith.constant 0 : index
    %c0_29 = arith.constant 0 : index
    %72 = vector.load %arg6[%c0_28, %c0_29] : memref<1x128xf32, #tpu.memory_space<vmem>>, vector<1x128xf32>
    %73 = vector.broadcast %72 : vector<1x128xf32> to vector<8x128xf32>
    %74 = arith.addf %71, %73 : vector<8x128xf32>
    %cst_30 = arith.constant dense<0.000000e+00> : vector<8xf32>
    %75 = vector.multi_reduction <add>, %74, %cst_30 [1] : vector<8x128xf32> to vector<8xf32>
    %76 = vector.shape_cast %75 : vector<8xf32> to vector<8x1xf32>
    %cst_31 = arith.constant 1.280000e+02 : f32
    %77 = vector.broadcast %cst_31 : f32 to vector<8x1xf32>
    %78 = arith.divf %76, %77 : vector<8x1xf32>
    %79 = vector.broadcast %78 : vector<8x1xf32> to vector<8x128xf32>
    %80 = arith.subf %74, %79 : vector<8x128xf32>
    %81 = arith.mulf %80, %80 : vector<8x128xf32>
    %cst_32 = arith.constant dense<0.000000e+00> : vector<8xf32>
    %82 = vector.multi_reduction <add>, %81, %cst_32 [1] : vector<8x128xf32> to vector<8xf32>
    %83 = vector.shape_cast %82 : vector<8xf32> to vector<8x1xf32>
    %cst_33 = arith.constant 1.280000e+02 : f32
    %84 = vector.broadcast %cst_33 : f32 to vector<8x1xf32>
    %85 = arith.divf %83, %84 : vector<8x1xf32>
    %cst_34 = arith.constant 9.99999974E-6 : f32
    %86 = vector.broadcast %cst_34 : f32 to vector<8x1xf32>
    %87 = arith.addf %85, %86 : vector<8x1xf32>
    %88 = math.rsqrt %87 : vector<8x1xf32>
    %89 = vector.broadcast %88 : vector<8x1xf32> to vector<8x128xf32>
    %90 = arith.mulf %80, %89 : vector<8x128xf32>
    %c0_35 = arith.constant 0 : index
    %c0_36 = arith.constant 0 : index
    %91 = vector.load %arg7[%c0_35, %c0_36] : memref<1x128xf32, #tpu.memory_space<vmem>>, vector<1x128xf32>
    %92 = vector.broadcast %91 : vector<1x128xf32> to vector<8x128xf32>
    %93 = arith.mulf %90, %92 : vector<8x128xf32>
    %c0_37 = arith.constant 0 : index
    %c0_38 = arith.constant 0 : index
    %94 = vector.load %arg8[%c0_37, %c0_38] : memref<1x128xf32, #tpu.memory_space<vmem>>, vector<1x128xf32>
    %95 = vector.broadcast %94 : vector<1x128xf32> to vector<8x128xf32>
    %96 = arith.addf %93, %95 : vector<8x128xf32>
    %c0_39 = arith.constant 0 : index
    %c0_40 = arith.constant 0 : index
    %97 = vector.load %arg9[%c0_39, %c0_40] : memref<128x128xf32, #tpu.memory_space<vmem>>, vector<128x128xf32>
    %cst_41 = arith.constant dense<0.000000e+00> : vector<8x128xf32>
    %98 = tpu.matmul %96, %97, %cst_41 {dimension_numbers = #tpu.dot_dimension_numbers<[1], [0], [0], [1], [0, 0, 1, 1], [], []>} : vector<8x128xf32>, vector<128x128xf32>, vector<8x128xf32> -> vector<8x128xf32>
    %c0_42 = arith.constant 0 : index
    %c0_43 = arith.constant 0 : index
    %99 = vector.load %arg10[%c0_42, %c0_43] : memref<1x128xf32, #tpu.memory_space<vmem>>, vector<1x128xf32>
    %100 = vector.broadcast %99 : vector<1x128xf32> to vector<8x128xf32>
    %101 = arith.addf %98, %100 : vector<8x128xf32>
    %c0_44 = arith.constant 0 : index
    %c0_45 = arith.constant 0 : index
    %102 = vector.load %arg11[%c0_44, %c0_45] : memref<128x256xf32, #tpu.memory_space<vmem>>, vector<128x256xf32>
    %cst_46 = arith.constant dense<0.000000e+00> : vector<16x256xf32>
    %103 = tpu.matmul %3, %102, %cst_46 {dimension_numbers = #tpu.dot_dimension_numbers<[1], [0], [0], [1], [0, 0, 1, 1], [], []>} : vector<16x128xf32>, vector<128x256xf32>, vector<16x256xf32> -> vector<16x256xf32>
    %c0_47 = arith.constant 0 : index
    %c0_48 = arith.constant 0 : index
    %104 = vector.load %arg12[%c0_47, %c0_48] : memref<1x256xf32, #tpu.memory_space<vmem>>, vector<1x256xf32>
    %105 = vector.broadcast %104 : vector<1x256xf32> to vector<16x256xf32>
    %106 = arith.addf %103, %105 : vector<16x256xf32>
    %107 = vector.extract_strided_slice %106 {offsets = [0, 0], sizes = [16, 128], strides = [1, 1]} : vector<16x256xf32> to vector<16x128xf32>
    %108 = vector.extract_strided_slice %106 {offsets = [0, 128], sizes = [16, 128], strides = [1, 1]} : vector<16x256xf32> to vector<16x128xf32>
    %109 = vector.extract_strided_slice %101 {offsets = [0, 0], sizes = [8, 32], strides = [1, 1]} : vector<8x128xf32> to vector<8x32xf32>
    %110 = vector.extract_strided_slice %107 {offsets = [0, 0], sizes = [16, 32], strides = [1, 1]} : vector<16x128xf32> to vector<16x32xf32>
    %111 = vector.extract_strided_slice %108 {offsets = [0, 0], sizes = [16, 32], strides = [1, 1]} : vector<16x128xf32> to vector<16x32xf32>
    "tpu.trace_start"() <{level = 10 : i32, message = "td,sd->ts"}> : () -> ()
    %cst_49 = arith.constant dense<0.000000e+00> : vector<8x16xf32>
    %112 = tpu.matmul %109, %110, %cst_49 {dimension_numbers = #tpu.dot_dimension_numbers<[1], [1], [0], [0], [0, 0, 1, 0], [], []>} : vector<8x32xf32>, vector<16x32xf32>, vector<8x16xf32> -> vector<8x16xf32>
    "tpu.trace_stop"() : () -> ()
    %cst_50 = arith.constant dense<0xFF800000> : vector<8xf32>
    %113 = vector.multi_reduction <maximumf>, %112, %cst_50 [1] : vector<8x16xf32> to vector<8xf32>
    %114 = vector.shape_cast %113 : vector<8xf32> to vector<8x1xf32>
    %115 = vector.broadcast %114 : vector<8x1xf32> to vector<8x16xf32>
    %116 = arith.subf %112, %115 : vector<8x16xf32>
    %117 = math.exp %116 : vector<8x16xf32>
    "tpu.trace_start"() <{level = 10 : i32, message = "ts,sd->td"}> : () -> ()
    %cst_51 = arith.constant dense<0.000000e+00> : vector<8x32xf32>
    %118 = tpu.matmul %117, %111, %cst_51 {dimension_numbers = #tpu.dot_dimension_numbers<[1], [0], [0], [1], [0, 0, 1, 1], [], []>} : vector<8x16xf32>, vector<16x32xf32>, vector<8x32xf32> -> vector<8x32xf32>
    "tpu.trace_stop"() : () -> ()
    %cst_52 = arith.constant dense<0.000000e+00> : vector<8xf32>
    %119 = vector.multi_reduction <add>, %117, %cst_52 [1] : vector<8x16xf32> to vector<8xf32>
    %120 = vector.shape_cast %119 : vector<8xf32> to vector<8x1xf32>
    %121 = vector.broadcast %120 : vector<8x1xf32> to vector<8x32xf32>
    %122 = arith.divf %118, %121 : vector<8x32xf32>
    %123 = vector.extract_strided_slice %101 {offsets = [0, 32], sizes = [8, 32], strides = [1, 1]} : vector<8x128xf32> to vector<8x32xf32>
    %124 = vector.extract_strided_slice %107 {offsets = [0, 32], sizes = [16, 32], strides = [1, 1]} : vector<16x128xf32> to vector<16x32xf32>
    %125 = vector.extract_strided_slice %108 {offsets = [0, 32], sizes = [16, 32], strides = [1, 1]} : vector<16x128xf32> to vector<16x32xf32>
    "tpu.trace_start"() <{level = 10 : i32, message = "td,sd->ts"}> : () -> ()
    %cst_53 = arith.constant dense<0.000000e+00> : vector<8x16xf32>
    %126 = tpu.matmul %123, %124, %cst_53 {dimension_numbers = #tpu.dot_dimension_numbers<[1], [1], [0], [0], [0, 0, 1, 0], [], []>} : vector<8x32xf32>, vector<16x32xf32>, vector<8x16xf32> -> vector<8x16xf32>
    "tpu.trace_stop"() : () -> ()
    %cst_54 = arith.constant dense<0xFF800000> : vector<8xf32>
    %127 = vector.multi_reduction <maximumf>, %126, %cst_54 [1] : vector<8x16xf32> to vector<8xf32>
    %128 = vector.shape_cast %127 : vector<8xf32> to vector<8x1xf32>
    %129 = vector.broadcast %128 : vector<8x1xf32> to vector<8x16xf32>
    %130 = arith.subf %126, %129 : vector<8x16xf32>
    %131 = math.exp %130 : vector<8x16xf32>
    "tpu.trace_start"() <{level = 10 : i32, message = "ts,sd->td"}> : () -> ()
    %cst_55 = arith.constant dense<0.000000e+00> : vector<8x32xf32>
    %132 = tpu.matmul %131, %125, %cst_55 {dimension_numbers = #tpu.dot_dimension_numbers<[1], [0], [0], [1], [0, 0, 1, 1], [], []>} : vector<8x16xf32>, vector<16x32xf32>, vector<8x32xf32> -> vector<8x32xf32>
    "tpu.trace_stop"() : () -> ()
    %cst_56 = arith.constant dense<0.000000e+00> : vector<8xf32>
    %133 = vector.multi_reduction <add>, %131, %cst_56 [1] : vector<8x16xf32> to vector<8xf32>
    %134 = vector.shape_cast %133 : vector<8xf32> to vector<8x1xf32>
    %135 = vector.broadcast %134 : vector<8x1xf32> to vector<8x32xf32>
    %136 = arith.divf %132, %135 : vector<8x32xf32>
    %137 = vector.extract_strided_slice %101 {offsets = [0, 64], sizes = [8, 32], strides = [1, 1]} : vector<8x128xf32> to vector<8x32xf32>
    %138 = vector.extract_strided_slice %107 {offsets = [0, 64], sizes = [16, 32], strides = [1, 1]} : vector<16x128xf32> to vector<16x32xf32>
    %139 = vector.extract_strided_slice %108 {offsets = [0, 64], sizes = [16, 32], strides = [1, 1]} : vector<16x128xf32> to vector<16x32xf32>
    "tpu.trace_start"() <{level = 10 : i32, message = "td,sd->ts"}> : () -> ()
    %cst_57 = arith.constant dense<0.000000e+00> : vector<8x16xf32>
    %140 = tpu.matmul %137, %138, %cst_57 {dimension_numbers = #tpu.dot_dimension_numbers<[1], [1], [0], [0], [0, 0, 1, 0], [], []>} : vector<8x32xf32>, vector<16x32xf32>, vector<8x16xf32> -> vector<8x16xf32>
    "tpu.trace_stop"() : () -> ()
    %cst_58 = arith.constant dense<0xFF800000> : vector<8xf32>
    %141 = vector.multi_reduction <maximumf>, %140, %cst_58 [1] : vector<8x16xf32> to vector<8xf32>
    %142 = vector.shape_cast %141 : vector<8xf32> to vector<8x1xf32>
    %143 = vector.broadcast %142 : vector<8x1xf32> to vector<8x16xf32>
    %144 = arith.subf %140, %143 : vector<8x16xf32>
    %145 = math.exp %144 : vector<8x16xf32>
    "tpu.trace_start"() <{level = 10 : i32, message = "ts,sd->td"}> : () -> ()
    %cst_59 = arith.constant dense<0.000000e+00> : vector<8x32xf32>
    %146 = tpu.matmul %145, %139, %cst_59 {dimension_numbers = #tpu.dot_dimension_numbers<[1], [0], [0], [1], [0, 0, 1, 1], [], []>} : vector<8x16xf32>, vector<16x32xf32>, vector<8x32xf32> -> vector<8x32xf32>
    "tpu.trace_stop"() : () -> ()
    %cst_60 = arith.constant dense<0.000000e+00> : vector<8xf32>
    %147 = vector.multi_reduction <add>, %145, %cst_60 [1] : vector<8x16xf32> to vector<8xf32>
    %148 = vector.shape_cast %147 : vector<8xf32> to vector<8x1xf32>
    %149 = vector.broadcast %148 : vector<8x1xf32> to vector<8x32xf32>
    %150 = arith.divf %146, %149 : vector<8x32xf32>
    %151 = vector.extract_strided_slice %101 {offsets = [0, 96], sizes = [8, 32], strides = [1, 1]} : vector<8x128xf32> to vector<8x32xf32>
    %152 = vector.extract_strided_slice %107 {offsets = [0, 96], sizes = [16, 32], strides = [1, 1]} : vector<16x128xf32> to vector<16x32xf32>
    %153 = vector.extract_strided_slice %108 {offsets = [0, 96], sizes = [16, 32], strides = [1, 1]} : vector<16x128xf32> to vector<16x32xf32>
    "tpu.trace_start"() <{level = 10 : i32, message = "td,sd->ts"}> : () -> ()
    %cst_61 = arith.constant dense<0.000000e+00> : vector<8x16xf32>
    %154 = tpu.matmul %151, %152, %cst_61 {dimension_numbers = #tpu.dot_dimension_numbers<[1], [1], [0], [0], [0, 0, 1, 0], [], []>} : vector<8x32xf32>, vector<16x32xf32>, vector<8x16xf32> -> vector<8x16xf32>
    "tpu.trace_stop"() : () -> ()
    %cst_62 = arith.constant dense<0xFF800000> : vector<8xf32>
    %155 = vector.multi_reduction <maximumf>, %154, %cst_62 [1] : vector<8x16xf32> to vector<8xf32>
    %156 = vector.shape_cast %155 : vector<8xf32> to vector<8x1xf32>
    %157 = vector.broadcast %156 : vector<8x1xf32> to vector<8x16xf32>
    %158 = arith.subf %154, %157 : vector<8x16xf32>
    %159 = math.exp %158 : vector<8x16xf32>
    "tpu.trace_start"() <{level = 10 : i32, message = "ts,sd->td"}> : () -> ()
    %cst_63 = arith.constant dense<0.000000e+00> : vector<8x32xf32>
    %160 = tpu.matmul %159, %153, %cst_63 {dimension_numbers = #tpu.dot_dimension_numbers<[1], [0], [0], [1], [0, 0, 1, 1], [], []>} : vector<8x16xf32>, vector<16x32xf32>, vector<8x32xf32> -> vector<8x32xf32>
    "tpu.trace_stop"() : () -> ()
    %cst_64 = arith.constant dense<0.000000e+00> : vector<8xf32>
    %161 = vector.multi_reduction <add>, %159, %cst_64 [1] : vector<8x16xf32> to vector<8xf32>
    %162 = vector.shape_cast %161 : vector<8xf32> to vector<8x1xf32>
    %163 = vector.broadcast %162 : vector<8x1xf32> to vector<8x32xf32>
    %164 = arith.divf %160, %163 : vector<8x32xf32>
    %165 = tpu.concatenate %122, %136, %150, %164 in 1 : vector<8x32xf32>, vector<8x32xf32>, vector<8x32xf32>, vector<8x32xf32> -> vector<8x128xf32>
    %c0_65 = arith.constant 0 : index
    %c0_66 = arith.constant 0 : index
    %166 = vector.load %arg13[%c0_65, %c0_66] : memref<128x128xf32, #tpu.memory_space<vmem>>, vector<128x128xf32>
    %cst_67 = arith.constant dense<0.000000e+00> : vector<8x128xf32>
    %167 = tpu.matmul %165, %166, %cst_67 {dimension_numbers = #tpu.dot_dimension_numbers<[1], [0], [0], [1], [0, 0, 1, 1], [], []>} : vector<8x128xf32>, vector<128x128xf32>, vector<8x128xf32> -> vector<8x128xf32>
    %168 = arith.addf %96, %167 : vector<8x128xf32>
    %c0_68 = arith.constant 0 : index
    %c0_69 = arith.constant 0 : index
    %169 = vector.load %arg14[%c0_68, %c0_69] : memref<1x128xf32, #tpu.memory_space<vmem>>, vector<1x128xf32>
    %170 = vector.broadcast %169 : vector<1x128xf32> to vector<8x128xf32>
    %171 = arith.addf %168, %170 : vector<8x128xf32>
    %cst_70 = arith.constant dense<0.000000e+00> : vector<8xf32>
    %172 = vector.multi_reduction <add>, %171, %cst_70 [1] : vector<8x128xf32> to vector<8xf32>
    %173 = vector.shape_cast %172 : vector<8xf32> to vector<8x1xf32>
    %cst_71 = arith.constant 1.280000e+02 : f32
    %174 = vector.broadcast %cst_71 : f32 to vector<8x1xf32>
    %175 = arith.divf %173, %174 : vector<8x1xf32>
    %176 = vector.broadcast %175 : vector<8x1xf32> to vector<8x128xf32>
    %177 = arith.subf %171, %176 : vector<8x128xf32>
    %178 = arith.mulf %177, %177 : vector<8x128xf32>
    %cst_72 = arith.constant dense<0.000000e+00> : vector<8xf32>
    %179 = vector.multi_reduction <add>, %178, %cst_72 [1] : vector<8x128xf32> to vector<8xf32>
    %180 = vector.shape_cast %179 : vector<8xf32> to vector<8x1xf32>
    %cst_73 = arith.constant 1.280000e+02 : f32
    %181 = vector.broadcast %cst_73 : f32 to vector<8x1xf32>
    %182 = arith.divf %180, %181 : vector<8x1xf32>
    %cst_74 = arith.constant 9.99999974E-6 : f32
    %183 = vector.broadcast %cst_74 : f32 to vector<8x1xf32>
    %184 = arith.addf %182, %183 : vector<8x1xf32>
    %185 = math.rsqrt %184 : vector<8x1xf32>
    %186 = vector.broadcast %185 : vector<8x1xf32> to vector<8x128xf32>
    %187 = arith.mulf %177, %186 : vector<8x128xf32>
    %c0_75 = arith.constant 0 : index
    %c0_76 = arith.constant 0 : index
    %188 = vector.load %arg15[%c0_75, %c0_76] : memref<1x128xf32, #tpu.memory_space<vmem>>, vector<1x128xf32>
    %189 = vector.broadcast %188 : vector<1x128xf32> to vector<8x128xf32>
    %190 = arith.mulf %187, %189 : vector<8x128xf32>
    %c0_77 = arith.constant 0 : index
    %c0_78 = arith.constant 0 : index
    %191 = vector.load %arg16[%c0_77, %c0_78] : memref<1x128xf32, #tpu.memory_space<vmem>>, vector<1x128xf32>
    %192 = vector.broadcast %191 : vector<1x128xf32> to vector<8x128xf32>
    %193 = arith.addf %190, %192 : vector<8x128xf32>
    %c0_79 = arith.constant 0 : index
    %c0_80 = arith.constant 0 : index
    %194 = vector.load %arg17[%c0_79, %c0_80] : memref<128x256xf32, #tpu.memory_space<vmem>>, vector<128x256xf32>
    %cst_81 = arith.constant dense<0.000000e+00> : vector<8x256xf32>
    %195 = tpu.matmul %193, %194, %cst_81 {dimension_numbers = #tpu.dot_dimension_numbers<[1], [0], [0], [1], [0, 0, 1, 1], [], []>} : vector<8x128xf32>, vector<128x256xf32>, vector<8x256xf32> -> vector<8x256xf32>
    %c0_82 = arith.constant 0 : index
    %c0_83 = arith.constant 0 : index
    %196 = vector.load %arg18[%c0_82, %c0_83] : memref<1x256xf32, #tpu.memory_space<vmem>>, vector<1x256xf32>
    %197 = vector.broadcast %196 : vector<1x256xf32> to vector<8x256xf32>
    %198 = arith.addf %195, %197 : vector<8x256xf32>
    %cst_84 = arith.constant 0.000000e+00 : f32
    %199 = vector.broadcast %cst_84 : f32 to vector<8x256xf32>
    %200 = arith.maximumf %198, %199 : vector<8x256xf32>
    %c0_85 = arith.constant 0 : index
    %c0_86 = arith.constant 0 : index
    %201 = vector.load %arg19[%c0_85, %c0_86] : memref<256x128xf32, #tpu.memory_space<vmem>>, vector<256x128xf32>
    %cst_87 = arith.constant dense<0.000000e+00> : vector<8x128xf32>
    %202 = tpu.matmul %200, %201, %cst_87 {dimension_numbers = #tpu.dot_dimension_numbers<[1], [0], [0], [1], [0, 0, 1, 1], [], []>} : vector<8x256xf32>, vector<256x128xf32>, vector<8x128xf32> -> vector<8x128xf32>
    %203 = arith.addf %193, %202 : vector<8x128xf32>
    %c0_88 = arith.constant 0 : index
    %c0_89 = arith.constant 0 : index
    %204 = vector.load %arg20[%c0_88, %c0_89] : memref<1x128xf32, #tpu.memory_space<vmem>>, vector<1x128xf32>
    %205 = vector.broadcast %204 : vector<1x128xf32> to vector<8x128xf32>
    %206 = arith.addf %203, %205 : vector<8x128xf32>
    %cst_90 = arith.constant dense<0.000000e+00> : vector<8xf32>
    %207 = vector.multi_reduction <add>, %206, %cst_90 [1] : vector<8x128xf32> to vector<8xf32>
    %208 = vector.shape_cast %207 : vector<8xf32> to vector<8x1xf32>
    %cst_91 = arith.constant 1.280000e+02 : f32
    %209 = vector.broadcast %cst_91 : f32 to vector<8x1xf32>
    %210 = arith.divf %208, %209 : vector<8x1xf32>
    %211 = vector.broadcast %210 : vector<8x1xf32> to vector<8x128xf32>
    %212 = arith.subf %206, %211 : vector<8x128xf32>
    %213 = arith.mulf %212, %212 : vector<8x128xf32>
    %cst_92 = arith.constant dense<0.000000e+00> : vector<8xf32>
    %214 = vector.multi_reduction <add>, %213, %cst_92 [1] : vector<8x128xf32> to vector<8xf32>
    %215 = vector.shape_cast %214 : vector<8xf32> to vector<8x1xf32>
    %cst_93 = arith.constant 1.280000e+02 : f32
    %216 = vector.broadcast %cst_93 : f32 to vector<8x1xf32>
    %217 = arith.divf %215, %216 : vector<8x1xf32>
    %cst_94 = arith.constant 9.99999974E-6 : f32
    %218 = vector.broadcast %cst_94 : f32 to vector<8x1xf32>
    %219 = arith.addf %217, %218 : vector<8x1xf32>
    %220 = math.rsqrt %219 : vector<8x1xf32>
    %221 = vector.broadcast %220 : vector<8x1xf32> to vector<8x128xf32>
    %222 = arith.mulf %212, %221 : vector<8x128xf32>
    %c0_95 = arith.constant 0 : index
    %c0_96 = arith.constant 0 : index
    %223 = vector.load %arg21[%c0_95, %c0_96] : memref<1x128xf32, #tpu.memory_space<vmem>>, vector<1x128xf32>
    %224 = vector.broadcast %223 : vector<1x128xf32> to vector<8x128xf32>
    %225 = arith.mulf %222, %224 : vector<8x128xf32>
    %c0_97 = arith.constant 0 : index
    %c0_98 = arith.constant 0 : index
    %226 = vector.load %arg22[%c0_97, %c0_98] : memref<1x128xf32, #tpu.memory_space<vmem>>, vector<1x128xf32>
    %227 = vector.broadcast %226 : vector<1x128xf32> to vector<8x128xf32>
    %228 = arith.addf %225, %227 : vector<8x128xf32>
    %c0_99 = arith.constant 0 : index
    %c0_100 = arith.constant 0 : index
    %c0_101 = arith.constant 0 : index
    %229 = vector.load %arg23[%c0_99, %c0_100, %c0_101] : memref<1x8x128xf32, #tpu.memory_space<vmem>>, vector<1x8x128xf32>
    %230 = vector.shape_cast %229 : vector<1x8x128xf32> to vector<8x128xf32>
    %231 = vector.shape_cast %228 : vector<8x128xf32> to vector<1x8x128xf32>
    tpu.vector_store %arg23[%c0_99, %c0_100, %c0_101], %231 {strides = array<i32>} : memref<1x8x128xf32, #tpu.memory_space<vmem>>, vector<1x8x128xf32>,
    return
  }
  func.func @transform_0(%arg0: i32) -> (i32, i32, i32) {
    %c0_i32 = arith.constant 0 : i32
    %c0_i32_0 = arith.constant 0 : i32
    %c0_i32_1 = arith.constant 0 : i32
    return %arg0, %c0_i32, %c0_i32_0 : i32, i32, i32
  }
  func.func @transform_1(%arg0: i32) -> (i32, i32, i32) {
    %c0_i32 = arith.constant 0 : i32
    %c0_i32_0 = arith.constant 0 : i32
    %c0_i32_1 = arith.constant 0 : i32
    return %arg0, %c0_i32, %c0_i32_0 : i32, i32, i32
  }
  func.func @transform_2(%arg0: i32) -> (i32, i32) {
    %c0_i32 = arith.constant 0 : i32
    %c0_i32_0 = arith.constant 0 : i32
    %c0_i32_1 = arith.constant 0 : i32
    return %c0_i32, %c0_i32_0 : i32, i32
  }
  func.func @transform_3(%arg0: i32) -> (i32, i32) {
    %c0_i32 = arith.constant 0 : i32
    %c0_i32_0 = arith.constant 0 : i32
    %c0_i32_1 = arith.constant 0 : i32
    return %c0_i32, %c0_i32_0 : i32, i32
  }
  func.func @transform_4(%arg0: i32) -> (i32, i32) {
    %c0_i32 = arith.constant 0 : i32
    %c0_i32_0 = arith.constant 0 : i32
    %c0_i32_1 = arith.constant 0 : i32
    return %c0_i32, %c0_i32_0 : i32, i32
  }
  func.func @transform_5(%arg0: i32) -> (i32, i32) {
    %c0_i32 = arith.constant 0 : i32
    %c0_i32_0 = arith.constant 0 : i32
    %c0_i32_1 = arith.constant 0 : i32
    return %c0_i32, %c0_i32_0 : i32, i32
  }
  func.func @transform_6(%arg0: i32) -> (i32, i32) {
    %c0_i32 = arith.constant 0 : i32
    %c0_i32_0 = arith.constant 0 : i32
    %c0_i32_1 = arith.constant 0 : i32
    return %c0_i32, %c0_i32_0 : i32, i32
  }
  func.func @transform_7(%arg0: i32) -> (i32, i32) {
    %c0_i32 = arith.constant 0 : i32
    %c0_i32_0 = arith.constant 0 : i32
    %c0_i32_1 = arith.constant 0 : i32
    return %c0_i32, %c0_i32_0 : i32, i32
  }
  func.func @transform_8(%arg0: i32) -> (i32, i32) {
    %c0_i32 = arith.constant 0 : i32
    %c0_i32_0 = arith.constant 0 : i32
    %c0_i32_1 = arith.constant 0 : i32
    return %c0_i32, %c0_i32_0 : i32, i32
  }
  func.func @transform_9(%arg0: i32) -> (i32, i32) {
    %c0_i32 = arith.constant 0 : i32
    %c0_i32_0 = arith.constant 0 : i32
    %c0_i32_1 = arith.constant 0 : i32
    return %c0_i32, %c0_i32_0 : i32, i32
  }
  func.func @transform_10(%arg0: i32) -> (i32, i32) {
    %c0_i32 = arith.constant 0 : i32
    %c0_i32_0 = arith.constant 0 : i32
    %c0_i32_1 = arith.constant 0 : i32
    return %c0_i32, %c0_i32_0 : i32, i32
  }
  func.func @transform_11(%arg0: i32) -> (i32, i32) {
    %c0_i32 = arith.constant 0 : i32
    %c0_i32_0 = arith.constant 0 : i32
    %c0_i32_1 = arith.constant 0 : i32
    return %c0_i32, %c0_i32_0 : i32, i32
  }
  func.func @transform_12(%arg0: i32) -> (i32, i32) {
    %c0_i32 = arith.constant 0 : i32
    %c0_i32_0 = arith.constant 0 : i32
    %c0_i32_1 = arith.constant 0 : i32
    return %c0_i32, %c0_i32_0 : i32, i32
  }
  func.func @transform_13(%arg0: i32) -> (i32, i32) {
    %c0_i32 = arith.constant 0 : i32
    %c0_i32_0 = arith.constant 0 : i32
    %c0_i32_1 = arith.constant 0 : i32
    return %c0_i32, %c0_i32_0 : i32, i32
  }
  func.func @transform_14(%arg0: i32) -> (i32, i32) {
    %c0_i32 = arith.constant 0 : i32
    %c0_i32_0 = arith.constant 0 : i32
    %c0_i32_1 = arith.constant 0 : i32
    return %c0_i32, %c0_i32_0 : i32, i32
  }
  func.func @transform_15(%arg0: i32) -> (i32, i32) {
    %c0_i32 = arith.constant 0 : i32
    %c0_i32_0 = arith.constant 0 : i32
    %c0_i32_1 = arith.constant 0 : i32
    return %c0_i32, %c0_i32_0 : i32, i32
  }
  func.func @transform_16(%arg0: i32) -> (i32, i32) {
    %c0_i32 = arith.constant 0 : i32
    %c0_i32_0 = arith.constant 0 : i32
    %c0_i32_1 = arith.constant 0 : i32
    return %c0_i32, %c0_i32_0 : i32, i32
  }
  func.func @transform_17(%arg0: i32) -> (i32, i32) {
    %c0_i32 = arith.constant 0 : i32
    %c0_i32_0 = arith.constant 0 : i32
    %c0_i32_1 = arith.constant 0 : i32
    return %c0_i32, %c0_i32_0 : i32, i32
  }
  func.func @transform_18(%arg0: i32) -> (i32, i32) {
    %c0_i32 = arith.constant 0 : i32
    %c0_i32_0 = arith.constant 0 : i32
    %c0_i32_1 = arith.constant 0 : i32
    return %c0_i32, %c0_i32_0 : i32, i32
  }
  func.func @transform_19(%arg0: i32) -> (i32, i32) {
    %c0_i32 = arith.constant 0 : i32
    %c0_i32_0 = arith.constant 0 : i32
    %c0_i32_1 = arith.constant 0 : i32
    return %c0_i32, %c0_i32_0 : i32, i32
  }
  func.func @transform_20(%arg0: i32) -> (i32, i32) {
    %c0_i32 = arith.constant 0 : i32
    %c0_i32_0 = arith.constant 0 : i32
    %c0_i32_1 = arith.constant 0 : i32
    return %c0_i32, %c0_i32_0 : i32, i32
  }
  func.func @transform_21(%arg0: i32) -> (i32, i32) {
    %c0_i32 = arith.constant 0 : i32
    %c0_i32_0 = arith.constant 0 : i32
    %c0_i32_1 = arith.constant 0 : i32
    return %c0_i32, %c0_i32_0 : i32, i32
  }
  func.func @transform_22(%arg0: i32) -> (i32, i32, i32) {
    %c0_i32 = arith.constant 0 : i32
    %c0_i32_0 = arith.constant 0 : i32
    %c0_i32_1 = arith.constant 0 : i32
    return %arg0, %c0_i32, %c0_i32_0 : i32, i32, i32
  }
}

</mosaic_0001>

<bundles_post_ra>
// kernel: transformer_decoder_layer.1
= control target key start
LH: loop header
LB: loop body
LE: loop exit
PB: predicated region body
PF: predicated region fallthrough
CT: control target
= control target key end

     0   :  { %s5329_s0 = inlined_call_operand.vmem [shape: f32[2,8,128], index: 0, kind: input, shape index: {}]   ;;  %s5330_s1 = inlined_call_operand.vmem [shape: f32[2,16,128], index: 1, kind: input, shape index: {}]   ;;  %s5331_s2 = inlined_call_operand.hbm [shape: f32[128,384], index: 2, kind: input, shape index: {}]   ;;  %s5332_s3 = inlined_call_operand.vmem [shape: f32[1,384], index: 3, kind: input, shape index: {}]   ;;  %s5333_s4 = inlined_call_operand.vmem [shape: f32[128,128], index: 4, kind: input, shape index: {}]   ;;  %s5334_s5 = inlined_call_operand.vmem [shape: f32[1,128], index: 5, kind: input, shape index: {}]   ;;  %s5335_s6 = inlined_call_operand.hbm [shape: f32[1,128], index: 6, kind: input, shape index: {}]   ;;  %s5336_s7 = inlined_call_operand.hbm [shape: f32[1,128], index: 7, kind: input, shape index: {}]   ;;  %s5337_s8 = inlined_call_operand.hbm [shape: f32[128,128], index: 8, kind: input, shape index: {}]   ;;  %s5338_s9 = inlined_call_operand.hbm [shape: f32[1,128], index: 9, kind: input, shape index: {}]   ;;  %s5339_s10 = inlined_call_operand.hbm [shape: f32[128,256], index: 10, kind: input, shape index: {}]   ;;  %s5340_s11 = inlined_call_operand.hbm [shape: f32[1,256], index: 11, kind: input, shape index: {}]   ;;  %s5341_s12 = inlined_call_operand.hbm [shape: f32[128,128], index: 12, kind: input, shape index: {}]   ;;  %s5342_s13 = inlined_call_operand.hbm [shape: f32[1,128], index: 13, kind: input, shape index: {}]   ;;  %s5343_s14 = inlined_call_operand.hbm [shape: f32[1,128], index: 14, kind: input, shape index: {}]   ;;  %s5344_s15 = inlined_call_operand.hbm [shape: f32[1,128], index: 15, kind: input, shape index: {}]   ;;  %s5345_s16 = inlined_call_operand.hbm [shape: f32[128,256], index: 16, kind: input, shape index: {}]   ;;  %s5346_s17 = inlined_call_operand.hbm [shape: f32[1,256], index: 17, kind: input, shape index: {}]   ;;  %s5347_s18 = inlined_call_operand.hbm [shape: f32[256,128], index: 18, kind: input, shape index: {}]   ;;  %s5348_s19 = inlined_call_operand.hbm [shape: f32[1,128], index: 19, kind: input, shape index: {}]   ;;  %s5349_s20 = inlined_call_operand.hbm [shape: f32[1,128], index: 20, kind: input, shape index: {}]   ;;  %s5350_s21 = inlined_call_operand.hbm [shape: f32[1,128], index: 21, kind: input, shape index: {}]   ;;  %s5351_s22 = inlined_call_operand.vmem [shape: f32[2,8,128], index: 22, kind: output, shape index: {}]  }
   0x1   :  { %5361 = sst [smem:[#allocation37_spill]] %s5329_s0 }
   0x2   :  { %5362 = sst [smem:[#allocation38_spill]] %s5330_s1 }
   0x3   :  { %5363 = sst [smem:[#allocation39_spill]] %s5331_s2 }
   0x4   :  { %5364 = sst [smem:[#allocation40_spill]] %s5332_s3 }
   0x5   :  { %5365 = sst [smem:[#allocation41_spill]] %s5333_s4 }
   0x6   :  { %5366 = sst [smem:[#allocation42_spill]] %s5334_s5 }
   0x7   :  { %5367 = sst [smem:[#allocation43_spill]] %s5335_s6 }
   0x8   :  { %5368 = sst [smem:[#allocation44_spill]] %s5337_s8 }
   0x9   :  { %5369 = sst [smem:[#allocation45_spill]] %s5339_s10 }
   0xa   :  { %27 = vsyncpa [#allocation3], 0 }
   0xb   :  { %28 = vsyncpa [#allocation5], 0 }
   0xc   :  { %29 = vsyncpa [#allocation8], 0 }
   0xd   :  { %30 = vsyncpa [#allocation11], 0 }
   0xe   :  { %31 = vsyncpa [#allocation14], 0 }
   0xf   :  { %32 = vsyncpa [#allocation17], 0 }
  0x10   :  { %33 = vsyncpa [#allocation20], 0 }
  0x11   :  { %34 = vsyncpa [#allocation23], 0 }
  0x12   :  { %35 = vsyncpa [#allocation26], 0  ;;  %s4769_s3 = smov 0  }
  0x13 LB: > { %s4626_s28 = smov [#allocation4]   ;;  %s4775_s30 = sadd.s32 4294967295, %s4624_s3   ;;  %s4624_s3 = sphi %s4769_s3, %s41_s3  }
  0x14   : > { %s579_s29 = sshll.u32 %s4626_s28, 4  ;;  %p3451_p0 = scmp.ge.s32.totalorder %s4624_s3, 1  ;;  %s580_s29 = int_to_ptr.vmem [resolvable:$true] %s579_s29 }
  0x15   : > { %p544_p1 = scmp.lt.s32.totalorder %s4624_s3, 3  ;;  %p5359_p2 = scmp.eq.s32.totalorder %s4775_s30, 0 }
  0x16   : > { %s4627_s0 = smov [#allocation7]   ;;  %s4628_s5 = smov [#allocation10]  }
  0x17   : > { %p4780_p3 = pnand %p3451_p0, %p544_p1  ;;  %s600_s23 = sshll.u32 %s4627_s0, 4  ;;  %s4786_s23 = int_to_ptr.vmem [resolvable:$true] %s600_s23 }
  0x18   : > { %s624_s24 = sshll.u32 %s4628_s5, 4  ;;  %s4151_s25 = scalar_lea.vmem %s580_s29, 16  ;;  %s4794_s24 = int_to_ptr.vmem [resolvable:$true] %s624_s24 }
  0x19   : > { %s5370_s4 = scalar_select %p4780_p3, 1, 0 }
  0x1a   : > { %p3980_p4 = pneg %p4780_p3  ;;  %p4152_p7 = scmp.ne.s32.totalorder %s580_s29, %s4151_s25 }
  0x1b   : > { %s4158_s26 = scalar_lea.vmem %s580_s29, 32  ;;  %p4159_p10 = scmp.lt.s32.totalorder %s580_s29, %s580_s29 }
  0x1c   : > { %p4790_p5 = pnand %p5359_p2, %p3980_p4  ;;  %p4160_p11 = scmp.lt.s32.totalorder %s4158_s26, %s4151_s25 }
  0x1e   : > { %p4798_p6 = pneg %p4790_p5  ;;  %p4161_p12 = por %p4160_p11, %p4159_p10 }
  0x20   : > { %p4154_p8 = pnand %p4152_p7, %p4798_p6 }
  0x22   : > { %p4155_p9 = pneg %p4154_p8 }
  0x24   : > { %p4162_p13 = pnand %p4161_p12, %p4155_p9 }
  0x26   : > { %4165 = shalt.err (!%p4162_p13)
}
  0x27   : > { %s5373_s28 = sld [smem:[#allocation43_spill]]  ;;  %s4177_s0 = scalar_lea.vmem %s4786_s23, 2048 }
  0x28   : > { %p4178_p0 = scmp.ne.s32.totalorder %s4786_s23, %s4177_s0  ;;  %p4185_p7 = scmp.lt.s32.totalorder %s4786_s23, %s4786_s23 }
  0x29   : > { %p4186_p8 = scmp.lt.s32.totalorder %s4177_s0, %s4177_s0 }
  0x2a   : > { %p4180_p1 = pnand %p4178_p0, %p4798_p6 }
  0x2b   : > { %p4187_p9 = por %p4186_p8, %p4185_p7 }
  0x2c   : > { %p4181_p4 = pneg %p4180_p1 }
  0x2d   : > { %3986 = dma.hbm_to_vmem [thread:$0]  (!%p4790_p5), %s5373_s28, 16, %s580_s29, [#allocation5]  }
  0x2e   : > { %p4188_p10 = pnand %p4187_p9, %p4181_p4 }
  0x30   : > { %4191 = shalt.err (!%p4188_p10)
}
  0x31   : > { %s5353_s5 = smov 128   ;;  %s5355_s25 = smov 8  }
  0x32   : > { %s5374_s8 = sld [smem:[#allocation44_spill]]  ;;  %s4203_s2 = scalar_lea.vmem %s4794_s24, 4096 }
  0x33   : > { %p4204_p11 = scmp.ne.s32.totalorder %s4794_s24, %s4203_s2  ;;  %p4211_p0 = scmp.lt.s32.totalorder %s4794_s24, %s4794_s24 }
  0x34   : > { %p4212_p1 = scmp.lt.s32.totalorder %s4203_s2, %s4203_s2 }
  0x35   : > { %p4206_p12 = pnand %p4204_p11, %p4798_p6 }
  0x36   : > { %p4213_p4 = por %p4212_p1, %p4211_p0 }
  0x37   : > { %p4207_p13 = pneg %p4206_p12 }
  0x38   : > { %3992 = dma.hbm_to_vmem [thread:$0]  (!%p4790_p5), %s5374_s8, 2048, %s4786_s23, [#allocation8], %s5353_s5, %s5353_s5, %s5355_s25  }
  0x39   : > { %p4214_p7 = pnand %p4213_p4, %p4207_p13 }
  0x3b   : > { %4217 = shalt.err (!%p4214_p7)
}
  0x3c   : > { %s5357_s27 = smov 256   ;;  %s5358_s28 = smov 16  }
  0x3d   : > { %s5375_s10 = sld [smem:[#allocation45_spill]]  ;;  %s4633_s29 = smov [#allocation13]  }
  0x3e   : > { %s648_s26 = sshll.u32 %s4633_s29, 4  ;;  %s4634_s5 = smov [#allocation16]   ;;  %s649_s26 = int_to_ptr.vmem [resolvable:$true] %s648_s26 }
  0x3f   : > { %s673_s2 = sshll.u32 %s4634_s5, 4  ;;  %s4229_s25 = scalar_lea.vmem %s649_s26, 2048  ;;  %s674_s2 = int_to_ptr.vmem [resolvable:$true] %s673_s2 }
  0x40   : > { %p4230_p8 = scmp.ne.s32.totalorder %s649_s26, %s4229_s25  ;;  %p4237_p11 = scmp.lt.s32.totalorder %s649_s26, %s649_s26 }
  0x41   : > { %p4238_p12 = scmp.lt.s32.totalorder %s4229_s25, %s4229_s25 }
  0x42   : > { %p4232_p9 = pnand %p4230_p8, %p4798_p6 }
  0x43   : > { %3998 = dma.hbm_to_vmem [thread:$0]  (!%p4790_p5), %s5375_s10, 4096, %s4794_s24, [#allocation11], %s5357_s27, %s5357_s27, %s5358_s28  }
  0x44   : > { %p4233_p10 = pneg %p4232_p9  ;;  %p4239_p13 = por %p4238_p12, %p4237_p11 }
  0x46   : > { %p4240_p0 = pnand %p4239_p13, %p4233_p10 }
  0x48   : > { %4243 = shalt.err (!%p4240_p0)
}
  0x49   : > { %s5376_s23 = smov 8   ;;  %s5377_s24 = smov 128  }
  0x4a   : > { %4004 = dma.hbm_to_vmem [thread:$0]  (!%p4790_p5), %s5341_s12, 2048, %s649_s26, [#allocation14], %s5377_s24, %s5377_s24, %s5376_s23  }
  0x4b   : > { %s4255_s5 = scalar_lea.vmem %s674_s2, 16  ;;  %s4262_s27 = scalar_lea.vmem %s674_s2, 32 }
  0x4c   : > { %p4256_p1 = scmp.ne.s32.totalorder %s674_s2, %s4255_s5  ;;  %p4263_p8 = scmp.lt.s32.totalorder %s674_s2, %s674_s2 }
  0x4d   : > { %p4264_p9 = scmp.lt.s32.totalorder %s4262_s27, %s4255_s5 }
  0x4e   : > { %p4258_p4 = pnand %p4256_p1, %p4798_p6 }
  0x4f   : > { %p4265_p10 = por %p4264_p9, %p4263_p8 }
  0x50   : > { %p4259_p7 = pneg %p4258_p4 }
  0x52   : > { %p4266_p11 = pnand %p4265_p10, %p4259_p7 }
  0x54   : > { %4269 = shalt.err (!%p4266_p11)
}
  0x55   : > { %4010 = dma.hbm_to_vmem [thread:$0]  (!%p4790_p5), %s5343_s14, 16, %s674_s2, [#allocation17]  }
  0x56   : > { %s4635_s0 = smov [#allocation19]   ;;  %s4636_s29 = smov [#allocation22]  }
  0x57   : > { %s694_s26 = sshll.u32 %s4635_s0, 4  ;;  %s718_s8 = sshll.u32 %s4636_s29, 4  ;;  %s695_s26 = int_to_ptr.vmem [resolvable:$true] %s694_s26  ;;  %s719_s8 = int_to_ptr.vmem [resolvable:$true] %s718_s8 }
  0x58   : > { %s4281_s10 = scalar_lea.vmem %s695_s26, 4096  ;;  %p4289_p1 = scmp.lt.s32.totalorder %s695_s26, %s695_s26 }
  0x59   : > { %p4282_p12 = scmp.ne.s32.totalorder %s695_s26, %s4281_s10  ;;  %p4290_p4 = scmp.lt.s32.totalorder %s4281_s10, %s4281_s10 }
  0x5b   : > { %p4284_p13 = pnand %p4282_p12, %p4798_p6  ;;  %p4291_p7 = por %p4290_p4, %p4289_p1 }
  0x5d   : > { %p4285_p0 = pneg %p4284_p13 }
  0x5f   : > { %p4292_p8 = pnand %p4291_p7, %p4285_p0 }
  0x61   : > { %4295 = shalt.err (!%p4292_p8)
}
  0x62   : > { %s5378_s27 = smov 16   ;;  %s5379_s28 = smov 256  }
  0x63   : > { %4016 = dma.hbm_to_vmem [thread:$0]  (!%p4790_p5), %s5345_s16, 4096, %s695_s26, [#allocation20], %s5379_s28, %s5379_s28, %s5378_s27  }
  0x64   : > { %s4307_s25 = scalar_lea.vmem %s719_s8, 4096  ;;  %p4315_p12 = scmp.lt.s32.totalorder %s719_s8, %s719_s8 }
  0x65   : > { %p4308_p9 = scmp.ne.s32.totalorder %s719_s8, %s4307_s25  ;;  %p4316_p13 = scmp.lt.s32.totalorder %s4307_s25, %s4307_s25 }
  0x67   : > { %p4310_p10 = pnand %p4308_p9, %p4798_p6  ;;  %p4317_p1 = por %p4316_p13, %p4315_p12 }
  0x69   : > { %p4311_p11 = pneg %p4310_p10 }
  0x6b   : > { %p4318_p0 = pnand %p4317_p1, %p4311_p11 }
  0x6d   : > { %4321 = shalt.err (!%p4318_p0)
}
  0x6e   : > { %4022 = dma.hbm_to_vmem [thread:$0]  (!%p4790_p5), %s5347_s18, 4096, %s719_s8, [#allocation23], %s5377_s24, %s5377_s24, %s5376_s23  }
  0x6f   : > { %s4637_s26 = smov [#allocation25]   ;;  %s4638_s27 = smov [#allocation2]  }
  0x70   : > { %s743_s29 = sshll.u32 %s4637_s26, 4  ;;  %s556_s28 = sshll.u32 %s4638_s27, 4  ;;  %s744_s29 = int_to_ptr.vmem [resolvable:$true] %s743_s29  ;;  %s557_s28 = int_to_ptr.vmem [resolvable:$true] %s556_s28 }
  0x71   : > { %s4333_s2 = scalar_lea.vmem %s744_s29, 16  ;;  %s4340_s5 = scalar_lea.vmem %s744_s29, 32 }
  0x72   : > { %p4334_p4 = scmp.ne.s32.totalorder %s744_s29, %s4333_s2  ;;  %p4341_p9 = scmp.lt.s32.totalorder %s744_s29, %s744_s29 }
  0x73   : > { %p4342_p10 = scmp.lt.s32.totalorder %s4340_s5, %s4333_s2 }
  0x74   : > { %p4336_p7 = pnand %p4334_p4, %p4798_p6 }
  0x75   : > { %p4343_p11 = por %p4342_p10, %p4341_p9 }
  0x76   : > { %p4337_p8 = pneg %p4336_p7 }
  0x78   : > { %p4344_p12 = pnand %p4343_p11, %p4337_p8 }
  0x7a   : > { %4347 = shalt.err (!%p4344_p12)
}
  0x7b   : > { %4028 = dma.hbm_to_vmem [thread:$0]  (!%p4790_p5), %s5349_s20, 16, %s744_s29, [#allocation26]  }
  0x7c   : > { %s4359_s24 = scalar_lea.vmem %s557_s28, 6144  ;;  %p4367_p4 = scmp.lt.s32.totalorder %s557_s28, %s557_s28 }
  0x7d   : > { %p4360_p13 = scmp.ne.s32.totalorder %s557_s28, %s4359_s24  ;;  %p4368_p7 = scmp.lt.s32.totalorder %s4359_s24, %s4359_s24 }
  0x7f   : > { %p4362_p1 = pnand %p4360_p13, %p4798_p6  ;;  %p4369_p2 = por %p4368_p7, %p4367_p4 }
  0x81   : > { %p4363_p0 = pneg %p4362_p1 }
  0x83   : > { %p4370_p3 = pnand %p4369_p2, %p4363_p0 }
  0x85   : > { %4373 = shalt.err (!%p4370_p3)
}
  0x86   : > { %s4639_s25 = smov 384   ;;  %s4640_s10 = smov 24  }
  0x87   : > { %s5380_s27 = sld [smem:[#allocation39_spill]]  ;;  %s4641_s29 = smov [#allocation6]  }
  0x88   : > { %s590_s2 = sshll.u32 %s4641_s29, 4  ;;  %s4642_s5 = smov [#allocation9]   ;;  %s591_s2 = int_to_ptr.vmem [resolvable:$true] %s590_s2 }
  0x89   : > { %s614_s8 = sshll.u32 %s4642_s5, 4  ;;  %s4385_s23 = scalar_lea.vmem %s591_s2, 16  ;;  %s615_s8 = int_to_ptr.vmem [resolvable:$true] %s614_s8 }
  0x8a   : > { %p4386_p8 = scmp.ne.s32.totalorder %s591_s2, %s4385_s23  ;;  %s4392_s24 = scalar_lea.vmem %s591_s2, 32 }
  0x8b   : > { %p4393_p9 = scmp.lt.s32.totalorder %s591_s2, %s591_s2  ;;  %p4394_p10 = scmp.lt.s32.totalorder %s4392_s24, %s4385_s23 }
  0x8c   : > { %p4388_p2 = pnand %p4386_p8, %p4798_p6 }
  0x8d   : > { %3983 = dma.hbm_to_vmem [thread:$0]  (!%p4790_p5), %s5380_s27, 6144, %s557_s28, [#allocation3], %s4639_s25, %s4639_s25, %s4640_s10  }
  0x8e   : > { %p4389_p3 = pneg %p4388_p2  ;;  %p4395_p11 = por %p4394_p10, %p4393_p9 }
  0x90   : > { %p4396_p12 = pnand %p4395_p11, %p4389_p3 }
  0x92   : > { %4399 = shalt.err (!%p4396_p12)
}
  0x93   : > { %3989 = dma.hbm_to_vmem [thread:$0]  (!%p4790_p5), %s5336_s7, 16, %s591_s2, [#allocation5]  }
  0x94   : > { %s4411_s10 = scalar_lea.vmem %s615_s8, 16  ;;  %s4418_s0 = scalar_lea.vmem %s615_s8, 32 }
  0x95   : > { %p4412_p13 = scmp.ne.s32.totalorder %s615_s8, %s4411_s10  ;;  %p4419_p4 = scmp.lt.s32.totalorder %s615_s8, %s615_s8 }
  0x96   : > { %p4420_p7 = scmp.lt.s32.totalorder %s4418_s0, %s4411_s10 }
  0x97   : > { %p4414_p1 = pnand %p4412_p13, %p4798_p6 }
  0x98   : > { %p4421_p8 = por %p4420_p7, %p4419_p4 }
  0x99   : > { %p4415_p0 = pneg %p4414_p1 }
  0x9b   : > { %p4422_p2 = pnand %p4421_p8, %p4415_p0 }
  0x9d   : > { %4425 = shalt.err (!%p4422_p2)
}
  0x9e   : > { %3995 = dma.hbm_to_vmem [thread:$0]  (!%p4790_p5), %s5338_s9, 16, %s615_s8, [#allocation8]  }
  0x9f   : > { %s4643_s29 = smov [#allocation12]   ;;  %s4644_s5 = smov [#allocation15]  }
  0xa0   : > { %s638_s2 = sshll.u32 %s4643_s29, 4  ;;  %s662_s23 = sshll.u32 %s4644_s5, 4  ;;  %s639_s2 = int_to_ptr.vmem [resolvable:$true] %s638_s2  ;;  %s663_s23 = int_to_ptr.vmem [resolvable:$true] %s662_s23 }
  0xa1   : > { %s4437_s24 = scalar_lea.vmem %s639_s2, 32  ;;  %p4445_p11 = scmp.lt.s32.totalorder %s639_s2, %s639_s2 }
  0xa2   : > { %p4438_p3 = scmp.ne.s32.totalorder %s639_s2, %s4437_s24  ;;  %p4446_p12 = scmp.lt.s32.totalorder %s4437_s24, %s4437_s24 }
  0xa4   : > { %p4440_p9 = pnand %p4438_p3, %p4798_p6  ;;  %p4447_p13 = por %p4446_p12, %p4445_p11 }
  0xa6   : > { %p4441_p10 = pneg %p4440_p9 }
  0xa8   : > { %p4448_p1 = pnand %p4447_p13, %p4441_p10 }
  0xaa   : > { %4451 = shalt.err (!%p4448_p1)
}
  0xab   : > { %4001 = dma.hbm_to_vmem [thread:$0]  (!%p4790_p5), %s5340_s11, 32, %s639_s2, [#allocation11]  }
  0xac   : > { %s4463_s25 = scalar_lea.vmem %s663_s23, 16  ;;  %s4470_s10 = scalar_lea.vmem %s663_s23, 32 }
  0xad   : > { %p4464_p0 = scmp.ne.s32.totalorder %s663_s23, %s4463_s25  ;;  %p4471_p8 = scmp.lt.s32.totalorder %s663_s23, %s663_s23 }
  0xae   : > { %p4472_p2 = scmp.lt.s32.totalorder %s4470_s10, %s4463_s25 }
  0xaf   : > { %p4466_p4 = pnand %p4464_p0, %p4798_p6 }
  0xb0   : > { %p4473_p3 = por %p4472_p2, %p4471_p8 }
  0xb1   : > { %p4467_p7 = pneg %p4466_p4 }
  0xb3   : > { %p4474_p9 = pnand %p4473_p3, %p4467_p7 }
  0xb5   : > { %4477 = shalt.err (!%p4474_p9)
}
  0xb6   : > { %4007 = dma.hbm_to_vmem [thread:$0]  (!%p4790_p5), %s5342_s13, 16, %s663_s23, [#allocation14]  }
  0xb7   : > { %s4645_s27 = smov [#allocation18]   ;;  %s4646_s2 = smov [#allocation21]  }
  0xb8   : > { %s684_s29 = sshll.u32 %s4645_s27, 4  ;;  %s708_s5 = sshll.u32 %s4646_s2, 4  ;;  %s685_s29 = int_to_ptr.vmem [resolvable:$true] %s684_s29  ;;  %s709_s5 = int_to_ptr.vmem [resolvable:$true] %s708_s5 }
  0xb9   : > { %s4489_s24 = scalar_lea.vmem %s685_s29, 16  ;;  %s4496_s28 = scalar_lea.vmem %s685_s29, 32 }
  0xba   : > { %p4490_p10 = scmp.ne.s32.totalorder %s685_s29, %s4489_s24  ;;  %p4497_p13 = scmp.lt.s32.totalorder %s685_s29, %s685_s29 }
  0xbb   : > { %p4498_p1 = scmp.lt.s32.totalorder %s4496_s28, %s4489_s24 }
  0xbc   : > { %p4492_p11 = pnand %p4490_p10, %p4798_p6 }
  0xbd   : > { %p4499_p0 = por %p4498_p1, %p4497_p13 }
  0xbe   : > { %p4493_p12 = pneg %p4492_p11 }
  0xc0   : > { %p4500_p4 = pnand %p4499_p0, %p4493_p12 }
  0xc2   : > { %4503 = shalt.err (!%p4500_p4)
}
  0xc3   : > { %4013 = dma.hbm_to_vmem [thread:$0]  (!%p4790_p5), %s5344_s15, 16, %s685_s29, [#allocation17]  }
  0xc4   : > { %s4515_s25 = scalar_lea.vmem %s709_s5, 32  ;;  %p4523_p3 = scmp.lt.s32.totalorder %s709_s5, %s709_s5 }
  0xc5   : > { %p4516_p7 = scmp.ne.s32.totalorder %s709_s5, %s4515_s25  ;;  %p4524_p9 = scmp.lt.s32.totalorder %s4515_s25, %s4515_s25 }
  0xc7   : > { %p4518_p8 = pnand %p4516_p7, %p4798_p6  ;;  %p4525_p10 = por %p4524_p9, %p4523_p3 }
  0xc9   : > { %p4519_p2 = pneg %p4518_p8 }
  0xcb   : > { %p4526_p11 = pnand %p4525_p10, %p4519_p2 }
  0xcd   : > { %4529 = shalt.err (!%p4526_p11)
}
  0xce   : > { %4019 = dma.hbm_to_vmem [thread:$0]  (!%p4790_p5), %s5346_s17, 32, %s709_s5, [#allocation20]  }
  0xcf   : > { %s4647_s26 = smov [#allocation24]   ;;  %s4648_s29 = smov [#allocation27]  }
  0xd0   : > { %s732_s27 = sshll.u32 %s4647_s26, 4  ;;  %s754_s2 = sshll.u32 %s4648_s29, 4  ;;  %s733_s27 = int_to_ptr.vmem [resolvable:$true] %s732_s27  ;;  %s755_s2 = int_to_ptr.vmem [resolvable:$true] %s754_s2 }
  0xd1   : > { %s4541_s24 = scalar_lea.vmem %s733_s27, 16  ;;  %s4548_s28 = scalar_lea.vmem %s733_s27, 32 }
  0xd2   : > { %p4542_p12 = scmp.ne.s32.totalorder %s733_s27, %s4541_s24  ;;  %p4549_p0 = scmp.lt.s32.totalorder %s733_s27, %s733_s27 }
  0xd3   : > { %p4550_p4 = scmp.lt.s32.totalorder %s4548_s28, %s4541_s24 }
  0xd4   : > { %p4544_p13 = pnand %p4542_p12, %p4798_p6 }
  0xd5   : > { %p4551_p7 = por %p4550_p4, %p4549_p0 }
  0xd6   : > { %p4545_p1 = pneg %p4544_p13 }
  0xd8   : > { %p4552_p8 = pnand %p4551_p7, %p4545_p1 }
  0xda   : > { %4555 = shalt.err (!%p4552_p8)
}
  0xdb   : > { %4025 = dma.hbm_to_vmem [thread:$0]  (!%p4790_p5), %s5348_s19, 16, %s733_s27, [#allocation23]  }
  0xdc   : > { %s4567_s8 = scalar_lea.vmem %s755_s2, 16  ;;  %s4574_s25 = scalar_lea.vmem %s755_s2, 32 }
  0xdd   : > { %p4568_p2 = scmp.ne.s32.totalorder %s755_s2, %s4567_s8  ;;  %p4575_p10 = scmp.lt.s32.totalorder %s755_s2, %s755_s2 }
  0xde   : > { %p4576_p11 = scmp.lt.s32.totalorder %s4574_s25, %s4567_s8 }
  0xdf   : > { %p4570_p3 = pnand %p4568_p2, %p4798_p6 }
  0xe0   : > { %p4577_p12 = por %p4576_p11, %p4575_p10 }
  0xe1   : > { %p4571_p9 = pneg %p4570_p3 }
  0xe3   : > { %p4578_p13 = pnand %p4577_p12, %p4571_p9 }
  0xe5   : > { %4581 = shalt.err (!%p4578_p13)
}
  0xe6   : > { %4031 = dma.hbm_to_vmem [thread:$0]  (!%p4790_p5), %s5350_s21, 16, %s755_s2, [#allocation26]  }
  0xe7   : > { %p5381_p1 = scmp.ne.s32.totalorder %s5370_s4, 0 }
  0xe8   : > { %p5382_p0 = scmp.eq.s32.totalorder (!%p5381_p1), %s4775_s30, 0 }
  0xe9   : > { %782 = sbr.rel (%p5381_p1) target bundleno = 5164 (0x142c), region = 108 }
  0xee   : > { %4587 = dma.done.wait (%p5382_p0), [#allocation3], 6144   ;;  %p5383_p6 = pmov %p5382_p0 }
  0xef   : > { %p5384_p4 = pmov %p5382_p0 }
  0xf0   : > { %4589 = vsyncadd (%p5383_p6), [#allocation3], 4294961152 }
  0xf1   : > { %4591 = dma.done.wait (%p5384_p4), [#allocation5], 32   ;;  %p5385_p7 = pmov %p5382_p0 }
  0xf2   : > { %p5386_p8 = pmov %p5382_p0 }
  0xf3   : > { %4593 = vsyncadd (%p5385_p7), [#allocation5], 4294967264 }
  0xf4   : > { %4595 = dma.done.wait (%p5386_p8), [#allocation8], 2064   ;;  %p5387_p5 = pmov %p5382_p0 }
  0xf5   : > { %p5388_p2 = pmov %p5382_p0 }
  0xf6   : > { %4597 = vsyncadd (%p5387_p5), [#allocation8], 4294965232 }
  0xf7   : > { %4599 = dma.done.wait (%p5388_p2), [#allocation11], 4128   ;;  %p5389_p3 = pmov %p5382_p0 }
  0xf8   : > { %p5390_p9 = pmov %p5382_p0 }
  0xf9   : > { %4601 = vsyncadd (%p5389_p3), [#allocation11], 4294963168 }
  0xfa   : > { %4603 = dma.done.wait (%p5390_p9), [#allocation14], 2064   ;;  %p5391_p10 = pmov %p5382_p0 }
  0xfb   : > { %p5392_p11 = pmov %p5382_p0 }
  0xfc   : > { %4605 = vsyncadd (%p5391_p10), [#allocation14], 4294965232 }
  0xfd   : > { %4607 = dma.done.wait (%p5392_p11), [#allocation17], 32   ;;  %p5393_p12 = pmov %p5382_p0 }
  0xfe   : > { %p5394_p13 = pmov %p5382_p0 }
  0xff   : > { %4609 = vsyncadd (%p5393_p12), [#allocation17], 4294967264 }
 0x100   : > { %4611 = dma.done.wait (%p5394_p13), [#allocation20], 4128   ;;  %p5395_p1 = pmov %p5382_p0 }
 0x102   : > { %4613 = vsyncadd (%p5395_p1), [#allocation20], 4294963168 }
 0x103   : > { %4615 = dma.done.wait (%p5382_p0), [#allocation23], 4112   ;;  %p5396_p6 = pmov %p5382_p0 }
 0x104   : > { %p5397_p4 = pmov %p5382_p0 }
 0x105   : > { %4617 = vsyncadd (%p5396_p6), [#allocation23], 4294963184 }
 0x106   : > { %4619 = dma.done.wait (%p5397_p4), [#allocation26], 32   ;;  %p5398_p7 = pmov %p5382_p0 }
 0x107   : > { %v4649_v0 = vmov 0.0   ;;  %v973_v1 = vld [vmem:[#allocation2 + $0x170] sm:$0xff]  ;;  %v972_v2 = vld [vmem:[#allocation2 + $0x168] sm:$0xff]  ;;  %v970_v3 = vld [vmem:[#allocation2 + $0x158] sm:$0xff]  ;;  %p911_p8 = scmp.lt.s32.totalorder %s4775_s30, 1  ;;  %s5399_s26 = sld [smem:[#allocation37_spill]]  ;;  %v977_v50 = vlaneseq }
 0x108   : > { %4621 = vsyncadd (%p5398_p7), [#allocation26], 4294967264  ;;  %1056 = vmatprep.mubr.f32.mxu0 %v4649_v0  ;;  %3676 = vmatprep.subr.mxu1 %v4649_v0  ;;  %v969_v4 = vld [vmem:[#allocation2 + $0x150] sm:$0xff]  ;;  %v967_v5 = vld [vmem:[#allocation2 + $0x140] sm:$0xff]  ;;  %vm4650_vm0 = vmmov 0   ;;  %s5400_s24 = sld [smem:[#allocation40_spill]] }
 0x109   : > { %992 = vmatprep.subr.mxu0 %v973_v1  ;;  %v966_v6 = vld [vmem:[#allocation2 + $0x138] sm:$0xff]  ;;  %v964_v7 = vld [vmem:[#allocation2 + $0x128] sm:$0xff]  ;;  %v963_v8 = vld [vmem:[#allocation2 + $0x120] sm:$0xff]  ;;  %s5405_s30 = smov (!%p911_p8, %s4775_s30), 1  ;;  %3708 = vmatprep.mubr.msk.f32.mxu1 %vm4650_vm0, %v4649_v0  ;;  %v978_v51 = vshrl.u32 %v977_v50, 7  ;;  %vm1133_vm1 = vcmask 261120  }
 0x10a   : > { %993 = vmatpush1.msra.mxu0 %v972_v2  ;;  %v961_v9 = vld [vmem:[#allocation2 + $0x110] sm:$0xff]  ;;  %v960_v10 = vld [vmem:[#allocation2 + $0x108] sm:$0xff]  ;;  %v958_v11 = vld [vmem:[#allocation2 + $0xf8] sm:$0xff]  ;;  %s3488_s4 = sshll.u32 %s5405_s30, 3  ;;  %s4651_s28 = smov 96   ;;  %vm1210_vm2 = vcmask 64512  }
 0x10b   : > { %994 = vmatprep.subr.mxu0 %v970_v3  ;;  %v957_v12 = vld [vmem:[#allocation2 + $0xf0] sm:$0xff]  ;;  %v955_v13 = vld [vmem:[#allocation2 + $0xe0] sm:$0xff]  ;;  %v954_v14 = vld [vmem:[#allocation2 + $0xd8] sm:$0xff]  ;;  %v5025_v52 = vsub.s32 0, %v978_v51  ;;  %v5030_v54 = vsub.s32 1, %v978_v51  ;;  %s4652_s5 = smov 64  }
 0x10c   : > { %995 = vmatpush1.msra.mxu0 %v969_v4  ;;  %v974_v15 = vld [vmem:[#allocation2 + $0x178] sm:$0xff]  ;;  %v971_v16 = vld [vmem:[#allocation2 + $0x160] sm:$0xff]  ;;  %v952_v17 = vld [vmem:[#allocation2 + $0xc8] sm:$0xff]  ;;  %s4653_s23 = smov 32   ;;  %v987_v61 = vsub.s32 2, %v978_v51  ;;  %s5401_s10 = sld [smem:[#allocation41_spill]] }
 0x10d   : > { %996 = vmatprep.subr.mxu0 %v967_v5  ;;  %3677 = vmatpush3.msra.mxu1 %v974_v15  ;;  %v951_v18 = vld [vmem:[#allocation2 + $0xc0] sm:$0xff]  ;;  %v968_v19 = vld [vmem:[#allocation2 + $0x148] sm:$0xff]  ;;  %v949_v20 = vld [vmem:[#allocation2 + $0xb0] sm:$0xff]  ;;  %s914_s27 = scalar_lea.vmem %s5399_s26, %s3488_s4  ;;  %vm1804_vm3 = vcmask 523264   ;;  %vm1806_vm4 = vcmask 785408   ;;  %s5402_s6 = sld [smem:[#allocation42_spill]] }
 0x10e   : > { %997 = vmatpush1.msra.mxu0 %v966_v6  ;;  %3678 = vmatprep.subr.mxu1 %v4649_v0  ;;  %v948_v21 = vld [vmem:[#allocation2 + $0xa8] sm:$0xff]  ;;  %v965_v22 = vld [vmem:[#allocation2 + $0x130] sm:$0xff]  ;;  %v946_v23 = vld [vmem:[#allocation2 + $0x98] sm:$0xff]  ;;  %s3532_s26 = sshll.u32 %s5405_s30, 4  ;;  %s5403_s2 = sld [smem:[#allocation38_spill]]  ;;  %vm2224_vm5 = vcmask 130048  }
 0x10f   : > { %998 = vmatprep.subr.mxu0 %v964_v7  ;;  %3679 = vmatpush3.msra.mxu1 %v971_v16  ;;  %v945_v24 = vld [vmem:[#allocation2 + $0x90] sm:$0xff]  ;;  %v962_v25 = vld [vmem:[#allocation2 + $0x118] sm:$0xff]  ;;  %v943_v26 = vld [vmem:[#allocation2 + $0x80] sm:$0xff] }
 0x110   : > { %999 = vmatpush1.msra.mxu0 %v963_v8  ;;  %3680 = vmatprep.subr.mxu1 %v4649_v0  ;;  %v942_v27 = vld [vmem:[#allocation2 + $0x78] sm:$0xff]  ;;  %v959_v28 = vld [vmem:[#allocation2 + $0x100] sm:$0xff]  ;;  %v940_v29 = vld [vmem:[#allocation2 + $0x68] sm:$0xff] }
 0x111   : > { %1000 = vmatprep.subr.mxu0 %v961_v9  ;;  %3681 = vmatpush3.msra.mxu1 %v968_v19  ;;  %v939_v30 = vld [vmem:[#allocation2 + $0x60] sm:$0xff]  ;;  %v956_v31 = vld [vmem:[#allocation2 + $0xe8] sm:$0xff]  ;;  %v937_v32 = vld [vmem:[#allocation2 + $0x50] sm:$0xff] }
 0x112   : > { %1001 = vmatpush1.msra.mxu0 %v960_v10  ;;  %3682 = vmatprep.subr.mxu1 %v4649_v0  ;;  %v936_v33 = vld [vmem:[#allocation2 + $0x48] sm:$0xff]  ;;  %v953_v34 = vld [vmem:[#allocation2 + $0xd0] sm:$0xff]  ;;  %v934_v35 = vld [vmem:[#allocation2 + $0x38] sm:$0xff] }
 0x113   : > { %1002 = vmatprep.subr.mxu0 %v958_v11  ;;  %3683 = vmatpush3.msra.mxu1 %v965_v22  ;;  %v933_v36 = vld [vmem:[#allocation2 + $0x30] sm:$0xff]  ;;  %v950_v37 = vld [vmem:[#allocation2 + $0xb8] sm:$0xff]  ;;  %v931_v38 = vld [vmem:[#allocation2 + $0x20] sm:$0xff] }
 0x114   : > { %1003 = vmatpush1.msra.mxu0 %v957_v12  ;;  %3684 = vmatprep.subr.mxu1 %v4649_v0  ;;  %v930_v39 = vld [vmem:[#allocation2 + $0x18] sm:$0xff]  ;;  %v947_v40 = vld [vmem:[#allocation2 + $0xa0] sm:$0xff]  ;;  %v928_v41 = vld [vmem:[#allocation2 + $0x8] sm:$0xff] }
 0x115   : > { %1004 = vmatprep.subr.mxu0 %v955_v13  ;;  %3685 = vmatpush3.msra.mxu1 %v962_v25  ;;  %v927_v42 = vld [vmem:[#allocation2] sm:$0xff]  ;;  %v944_v43 = vld [vmem:[#allocation2 + $0x88] sm:$0xff]  ;;  %v941_v45 = vld [vmem:[#allocation2 + $0x70] sm:$0xff] }
 0x116   : > { %1005 = vmatpush1.msra.mxu0 %v954_v14  ;;  %3686 = vmatprep.subr.mxu1 %v4649_v0  ;;  %v5007_v44 = vld [vmem:[%s914_s27] sm:$0xff]  ;;  %v938_v46 = vld [vmem:[#allocation2 + $0x58] sm:$0xff]  ;;  %v932_v48 = vld [vmem:[#allocation2 + $0x28] sm:$0xff] }
 0x117   : > { %1006 = vmatprep.subr.mxu0 %v952_v17  ;;  %3687 = vmatpush3.msra.mxu1 %v959_v28  ;;  %v935_v47 = vld [vmem:[#allocation2 + $0x40] sm:$0xff]  ;;  %v929_v49 = vld [vmem:[#allocation2 + $0x10] sm:$0xff]  ;;  %v1819_v51 = vld [vmem:[%s5401_s10 + $0x58] sm:$0xff] }
 0x118   : > { %1007 = vmatpush1.msra.mxu0 %v951_v18  ;;  %3688 = vmatprep.subr.mxu1 %v4649_v0  ;;  %v975_v53 = vld [vmem:[%s5400_s24] sm:$0x7]  ;;  %s919_s24 = scalar_lea.vmem %s5403_s2, %s3532_s26 }
 0x119   : > { %1008 = vmatprep.subr.mxu0 %v949_v20  ;;  %3689 = vmatpush3.msra.mxu1 %v956_v31  ;;  %v980_v55 = vrot.slane %v975_v53, %v5025_v52  ;;  %v984_v56 = vrot.slane %v975_v53, %v5030_v54  ;;  %v988_v62 = vrot.slane %v975_v53, %v987_v61  ;;  %v1820_v50 = vld [vmem:[%s5401_s10 + $0x60] sm:$0xff]  ;;  %v1818_v53 = vld [vmem:[%s5401_s10 + $0x50] sm:$0xff] }
 0x11a   : > { %1009 = vmatpush1.msra.mxu0 %v948_v21  ;;  %3690 = vmatprep.subr.mxu1 %v4649_v0 }
 0x11b   : > { %1010 = vmatprep.subr.mxu0 %v946_v23  ;;  %3691 = vmatpush3.msra.mxu1 %v953_v34 }
 0x11c   : > { %1011 = vmatpush1.msra.mxu0 %v945_v24  ;;  %3692 = vmatprep.subr.mxu1 %v4649_v0 }
 0x11d   : > { %1012 = vmatprep.subr.mxu0 %v943_v26  ;;  %3693 = vmatpush3.msra.mxu1 %v950_v37 }
 0x11e   : > { %1013 = vmatpush1.msra.mxu0 %v942_v27  ;;  %3694 = vmatprep.subr.mxu1 %v4649_v0 }
 0x11f   : > { %1014 = vmatprep.subr.mxu0 %v940_v29  ;;  %3695 = vmatpush3.msra.mxu1 %v947_v40 }
 0x120   : > { %1015 = vmatpush1.msra.mxu0 %v939_v30  ;;  %3696 = vmatprep.subr.mxu1 %v4649_v0 }
 0x121   : > { %1016 = vmatprep.subr.mxu0 %v937_v32  ;;  %3697 = vmatpush3.msra.mxu1 %v944_v43 }
 0x122   : > { %1017 = vmatpush1.msra.mxu0 %v936_v33  ;;  %3698 = vmatprep.subr.mxu1 %v4649_v0 }
 0x123   : > { %1018 = vmatprep.subr.mxu0 %v934_v35  ;;  %3699 = vmatpush3.msra.mxu1 %v941_v45 }
 0x124   : > { %1019 = vmatpush1.msra.mxu0 %v933_v36  ;;  %3700 = vmatprep.subr.mxu1 %v4649_v0 }
 0x125   : > { %1020 = vmatprep.subr.mxu0 %v931_v38  ;;  %3701 = vmatpush3.msra.mxu1 %v938_v46 }
 0x126   : > { %1021 = vmatpush1.msra.mxu0 %v930_v39  ;;  %3702 = vmatprep.subr.mxu1 %v4649_v0 }
 0x127   : > { %1022 = vmatprep.subr.mxu0 %v928_v41  ;;  %3703 = vmatpush3.msra.mxu1 %v935_v47  ;;  %v1823_v47 = vld [vmem:[%s5401_s10 + $0x78] sm:$0xff] }
 0x128   : > { %1023 = vmatpush1.msra.mxu0 %v927_v42  ;;  %3704 = vmatprep.subr.mxu1 %v4649_v0 }
 0x129   : > { %1057 = vmatmul.mubr.f32.vlgmr.msra.gmra.mxu0 %v5007_v44  ;;  %3731 = vmatprep.subr.mxu0 %v4649_v0 }
 0x12a   : > { %3705 = vmatpush3.msra.mxu1 %v932_v48  ;;  %3733 = vmatprep.mubr.msk.f32.mxu0 %vm4650_vm0, %v4649_v0  ;;  %v1822_v48 = vld [vmem:[%s5401_s10 + $0x70] sm:$0xff] }
 0x12b   : > { %3706 = vmatprep.subr.mxu1 %v4649_v0 }
 0x12c   : > { %3707 = vmatpush3.msra.mxu1 %v929_v49  ;;  %v1821_v49 = vld [vmem:[%s5401_s10 + $0x68] sm:$0xff] }
 0x12d   : > { %3709 = vmatmul.mubr.f32.vlgmr.msra.gmra.mxu1 %v5007_v44  ;;  %3711 = vmatprep.subr.mxu1 %v4649_v0 }
 0x12e   : > { %3713 = vmatprep.mubr.msk.f32.mxu1 %vm4650_vm0, %v4649_v0 }
 0x1e9   : > { %v1058_v57 = vpop.f32.mrf.mxu0 }
 0x1ea   : > { %v1059_v58 = vadd.f32 %v1058_v57, %v980_v55  ;;  %v1817_v55 = vld [vmem:[%s5401_s10 + $0x48] sm:$0xff]  ;;  %v1815_v57 = vld [vmem:[%s5401_s10 + $0x38] sm:$0xff] }
 0x1eb   : > { %v1060_v59 = vpop.f32.mrf.mxu0 }
 0x1ec   : > { %v1061_v60 = vadd.f32 %v1060_v59, %v984_v56  ;;  %1295 = vrot.lane.b32.xlu1 %v1059_v58, %s4651_s28  ;;  %v1816_v56 = vld [vmem:[%s5401_s10 + $0x40] sm:$0xff]  ;;  %v1813_v59 = vld [vmem:[%s5401_s10 + $0x28] sm:$0xff] }
 0x1ed   : > { %v1129_v63 = vpop.f32.mrf.mxu1 }
 0x1ee   : > { %3712 = vmatpush3.xpose.msk.msra.mxu1 %vm1133_vm1, %v1061_v60  ;;  %v1130_v1 = vadd.f32 %v1129_v63, %v988_v62  ;;  %v1812_v62 = vld [vmem:[%s5401_s10 + $0x20] sm:$0xff]  ;;  %v1811_v63 = vld [vmem:[%s5401_s10 + $0x18] sm:$0xff] }
 0x1ef   : > { %3716 = vmatprep.subr.mxu1 %v4649_v0  ;;  %v3710_v2 = vpop.f32.mrf.mxu1 }
 0x1f0   : > { %1463 = vrot.lane.b32.xlu1 %v1061_v60, %s4652_s5  ;;  %v1810_v2 = vld [vmem:[%s5401_s10 + $0x10] sm:$0xff] }
 0x1f1   : > { %3714 = vmatmul.mubr.msk.f32.vlgmr.msra.gmra.mxu1 %vm1133_vm1, %v1059_v58 }
 0x1f2   : > { %3718 = vmatprep.mubr.msk.f32.mxu1 %vm4650_vm0, %v4649_v0  ;;  %3717 = vmatpush3.msra.mxu1 %v1130_v1 }
 0x1f3   : > { %3721 = vmatprep.subr.mxu1 %v4649_v0 }
 0x1f4   : > { %1461 = vrot.lane.b32.xlu1 %v1059_v58, %s4652_s5 }
 0x1f8   : > { %1628 = vrot.lane.b32.xlu1 %v1061_v60, %s4653_s23 }
 0x1fc   : > { %1626 = vrot.lane.b32.xlu1 %v1059_v58, %s4653_s23  ;;  %v1814_v58 = vld [vmem:[%s5401_s10 + $0x30] sm:$0xff] }
 0x25e   : > { %v1296_v3 = vpop.permute.xlu1 %1295 }
 0x262   : > { %v1464_v4 = vpop.permute.xlu1 %1463 }
 0x263   : > { %3732 = vmatpush3.xpose.msk.msra.mxu0 %vm1133_vm1, %v1464_v4  ;;  %v1808_v4 = vld [vmem:[%s5401_s10] sm:$0xff] }
 0x264   : > { %3741 = vmatprep.subr.mxu0 %v4649_v0 }
 0x266   : > { %v1462_v5 = vpop.permute.xlu1 %1461 }
 0x267   : > { %3734 = vmatmul.mubr.msk.f32.vlgmr.msra.gmra.mxu0 %vm1133_vm1, %v1462_v5 }
 0x268   : > { %3743 = vmatprep.mubr.msk.f32.mxu0 %vm4650_vm0, %v4649_v0 }
 0x26a   : > { %v1629_v6 = vpop.permute.xlu1 %1628 }
 0x26b   : > { %3742 = vmatpush3.xpose.msk.msra.mxu0 %vm1133_vm1, %v1629_v6 }
 0x26c   : > { %3751 = vmatprep.subr.mxu0 %v4649_v0 }
 0x26e   : > { %v1627_v7 = vpop.permute.xlu1 %1626 }
 0x26f   : > { %3744 = vmatmul.mubr.msk.f32.vlgmr.msra.gmra.mxu0 %vm1133_vm1, %v1627_v7 }
 0x270   : > { %3783 = vmatprep.mubr.msk.f32.mxu0 %vm4650_vm0, %v4649_v0  ;;  %3752 = vmatpush3.msra.mxu0 %v1823_v47  ;;  %v1943_v47 = vld [vmem:[#allocation7 + $0x60] sm:$0xff] }
 0x271   : > { %3753 = vmatprep.subr.mxu0 %v4649_v0 }
 0x272   : > { %3754 = vmatpush3.msra.mxu0 %v1822_v48  ;;  %v2042_v48 = vld [vmem:[#allocation10 + $0x90] sm:$0xff] }
 0x273   : > { %3755 = vmatprep.subr.mxu0 %v4649_v0 }
 0x274   : > { %3756 = vmatpush3.msra.mxu0 %v1821_v49  ;;  %v2041_v49 = vld [vmem:[#allocation10 + $0x88] sm:$0xff] }
 0x275   : > { %3757 = vmatprep.subr.mxu0 %v4649_v0 }
 0x276   : > { %3758 = vmatpush3.msra.mxu0 %v1820_v50  ;;  %v2040_v50 = vld [vmem:[#allocation10 + $0x80] sm:$0xff] }
 0x277   : > { %3759 = vmatprep.subr.mxu0 %v4649_v0 }
 0x278   : > { %3760 = vmatpush3.msra.mxu0 %v1819_v51  ;;  %v2039_v51 = vld [vmem:[#allocation10 + $0x78] sm:$0xff] }
 0x279   : > { %3761 = vmatprep.subr.mxu0 %v4649_v0 }
 0x27a   : > { %3762 = vmatpush3.msra.mxu0 %v1818_v53  ;;  %v2038_v53 = vld [vmem:[#allocation10 + $0x70] sm:$0xff] }
 0x27b   : > { %3763 = vmatprep.subr.mxu0 %v4649_v0 }
 0x27c   : > { %3764 = vmatpush3.msra.mxu0 %v1817_v55  ;;  %v2037_v55 = vld [vmem:[#allocation10 + $0x68] sm:$0xff] }
 0x27d   : > { %3765 = vmatprep.subr.mxu0 %v4649_v0 }
 0x27e   : > { %3766 = vmatpush3.msra.mxu0 %v1816_v56  ;;  %v2036_v56 = vld [vmem:[#allocation10 + $0x60] sm:$0xff] }
 0x27f   : > { %3767 = vmatprep.subr.mxu0 %v4649_v0 }
 0x280   : > { %3768 = vmatpush3.msra.mxu0 %v1815_v57  ;;  %v2035_v57 = vld [vmem:[#allocation10 + $0x58] sm:$0xff] }
 0x281   : > { %3769 = vmatprep.subr.mxu0 %v4649_v0 }
 0x282   : > { %3770 = vmatpush3.msra.mxu0 %v1814_v58  ;;  %v2034_v58 = vld [vmem:[#allocation10 + $0x50] sm:$0xff] }
 0x283   : > { %3771 = vmatprep.subr.mxu0 %v4649_v0 }
 0x284   : > { %3772 = vmatpush3.msra.mxu0 %v1813_v59  ;;  %v2033_v59 = vld [vmem:[#allocation10 + $0x48] sm:$0xff] }
 0x285   : > { %3773 = vmatprep.subr.mxu0 %v4649_v0 }
 0x286   : > { %3774 = vmatpush3.msra.mxu0 %v1812_v62  ;;  %v2030_v62 = vld [vmem:[#allocation10 + $0x30] sm:$0xff] }
 0x287   : > { %3775 = vmatprep.subr.mxu0 %v4649_v0 }
 0x288   : > { %3776 = vmatpush3.msra.mxu0 %v1811_v63 }
 0x289   : > { %3777 = vmatprep.subr.mxu0 %v4649_v0 }
 0x28a   : > { %3778 = vmatpush3.msra.mxu0 %v1810_v2 }
 0x28b   : > { %3779 = vmatprep.subr.mxu0 %v4649_v0 }
 0x2b1   : > { %v1206_v8 = vpop.f32.mrf.mxu1 }
 0x2b2   : > { %v1211_v9 = vsel %vm1210_vm2, %v1206_v8, -inf }
 0x2b3   : > { %1212 = vmax.xlane.f32.xlu0 %v1211_v9  ;;  %v3715_v10 = vpop.f32.mrf.mxu1 }
 0x2c9   : > { %1297 = vrot.lane.b32.xlu0 %v1061_v60, %s4651_s28 }
 0x327   : > { %v1535_v11 = vpop.f32.mrf.mxu0 }
 0x328   : > { %v1539_v12 = vsel %vm1210_vm2, %v1535_v11, -inf }
 0x329   : > { %v3735_v13 = vpop.f32.mrf.mxu0  ;;  %1540 = vmax.xlane.f32.xlu0 %v1539_v12 }
 0x32f   : > { %v1700_v14 = vpop.f32.mrf.mxu0 }
 0x330   : > { %v1704_v15 = vsel %vm1210_vm2, %v1700_v14, -inf }
 0x331   : > { %1705 = vmax.xlane.f32.xlu1 %v1704_v15  ;;  %v3745_v16 = vpop.f32.mrf.mxu0 }
 0x33c   : > { %v1213_v17 = vpop.xlane.xlu0 %1212 }
 0x33d   : > { %v1214_v18 = vsub.f32 %v1206_v8, %v1213_v17 }
 0x33f   : > { %v1215_v19 = vmul.f32 1.442695, %v1214_v18  ;;  %1380 = vrot.lane.b32.xlu0 %v1130_v1, %s4651_s28 }
 0x340   : > { %v1298_v21 = vpop.permute.xlu0 %1297 }
 0x341   : > { %4102 = vpow2.f32 %v1215_v19 }
 0x34e   : > { %v4103_v20 = vpop.eup %4102 }
 0x34f   : > { %3719 = vmatmul.mubr.msk.f32.vlgmr.msra.gmra.mxu1 %vm1210_vm2, %v4103_v20  ;;  %v1290_v46 = vsel %vm1210_vm2, %v4103_v20, 0.0 }
 0x350   : > { %3722 = vmatpush3.xpose.msk.msra.mxu1 %vm1133_vm1, %v1298_v21  ;;  %3723 = vmatprep.mubr.msk.f32.mxu1 %vm4650_vm0, %v4649_v0 }
 0x351   : > { %3726 = vmatprep.subr.mxu1 %v4649_v0 }
 0x353   : > { %3724 = vmatmul.mubr.msk.f32.vlgmr.msra.gmra.mxu1 %vm1133_vm1, %v1296_v3  ;;  %v1809_v3 = vld [vmem:[%s5401_s10 + $0x8] sm:$0xff] }
 0x354   : > { %3728 = vmatprep.mubr.msk.f32.mxu1 %vm4650_vm0, %v4649_v0  ;;  %3780 = vmatpush3.msra.mxu0 %v1809_v3 }
 0x355   : > { %3781 = vmatprep.subr.mxu0 %v4649_v0 }
 0x356   : > { %3782 = vmatpush3.msra.mxu0 %v1808_v4  ;;  %v2029_v4 = vld [vmem:[#allocation10 + $0x28] sm:$0xff] }
 0x3b2   : > { %v1541_v22 = vpop.xlane.xlu0 %1540 }
 0x3b3   : > { %v1542_v29 = vsub.f32 %v1535_v11, %v1541_v22 }
 0x3b5   : > { %v1543_v30 = vmul.f32 1.442695, %v1542_v29 }
 0x3b6   : > { %v1381_v23 = vpop.permute.xlu0 %1380 }
 0x3b7   : > { %3727 = vmatpush3.msra.mxu1 %v1381_v23  ;;  %4104 = vpow2.f32 %v1543_v30 }
 0x3b8   : > { %3736 = vmatprep.subr.mxu1 %v4649_v0 }
 0x3ba   : > { %v1706_v33 = vpop.xlane.xlu1 %1705 }
 0x3bb   : > { %v1707_v34 = vsub.f32 %v1700_v14, %v1706_v33  ;;  %v2053_v33 = vld [vmem:[#allocation10 + $0xe8] sm:$0xff] }
 0x3bd   : > { %v1708_v37 = vmul.f32 1.442695, %v1707_v34  ;;  %v2052_v34 = vld [vmem:[#allocation10 + $0xe0] sm:$0xff] }
 0x3c4   : > { %v4105_v31 = vpop.eup %4104 }
 0x3c5   : > { %v1621_v32 = vsel %vm1210_vm2, %v4105_v31, 0.0 }
 0x40f   : > { %v5069_v24 = vpop.f32.mrf.mxu1 }
 0x411   : > { %v3720_v25 = vpop.f32.mrf.mxu1 }
 0x413   : > { %v1369_v26 = vpop.f32.mrf.mxu1 }
 0x414   : > { %v1373_v27 = vsel %vm1210_vm2, %v1369_v26, -inf }
 0x415   : > { %1374 = vmax.xlane.f32.xlu1 %v1373_v27  ;;  %v3725_v28 = vpop.f32.mrf.mxu1 }
 0x416   : > { %v3504_v28 = vld [vmem:[%s5402_s6] ss:$0 sm:$0xff] }
 0x426   : > { %1545 = vrot.lane.b32.xlu1 %v1130_v1, %s4652_s5 }
 0x42a   : > { %1710 = vrot.lane.b32.xlu1 %v1130_v1, %s4653_s23 }
 0x44e   : > { %1622 = vadd.xlane.f32.xlu1 %v1621_v32  ;;  %v2054_v32 = vld [vmem:[#allocation10 + $0xf0] sm:$0xff] }
 0x49e   : > { %v1375_v35 = vpop.xlane.xlu1 %1374 }
 0x49f   : > { %v1376_v36 = vsub.f32 %v1369_v26, %v1375_v35  ;;  %v2051_v35 = vld [vmem:[#allocation10 + $0xd8] sm:$0xff] }
 0x4a1   : > { %v1377_v38 = vmul.f32 1.442695, %v1376_v36  ;;  %v2050_v36 = vld [vmem:[#allocation10 + $0xd0] sm:$0xff] }
 0x4a2   : > { %v1546_v39 = vpop.permute.xlu1 %1545 }
 0x4a3   : > { %4106 = vpow2.f32 %v1377_v38  ;;  %v2048_v38 = vld [vmem:[#allocation10 + $0xc0] sm:$0xff] }
 0x4a4   : > { %4108 = vpow2.f32 %v1708_v37  ;;  %v2049_v37 = vld [vmem:[#allocation10 + $0xc8] sm:$0xff] }
 0x4a6   : > { %v1711_v43 = vpop.permute.xlu1 %1710 }
 0x4b0   : > { %v4107_v40 = vpop.eup %4106 }
 0x4b1   : > { %3729 = vmatmul.mubr.msk.f32.vlgmr.msra.gmra.mxu1 %vm1210_vm2, %v4107_v40  ;;  %v1456_v41 = vsel %vm1210_vm2, %v4107_v40, 0.0  ;;  %v4109_v42 = vpop.eup %4108  ;;  %v2046_v40 = vld [vmem:[#allocation10 + $0xb0] sm:$0xff] }
 0x4b2   : > { %3737 = vmatpush3.msra.mxu1 %v1546_v39  ;;  %1457 = vadd.xlane.f32.xlu0 %v1456_v41  ;;  %v1786_v45 = vsel %vm1210_vm2, %v4109_v42, 0.0  ;;  %v1946_v39 = vld [vmem:[#allocation7 + $0x78] sm:$0xff]  ;;  %v1945_v41 = vld [vmem:[#allocation7 + $0x70] sm:$0xff] }
 0x4b3   : > { %3738 = vmatprep.mubr.msk.f32.mxu1 %vm4650_vm0, %v4649_v0  ;;  %3746 = vmatprep.subr.mxu1 %v4649_v0 }
 0x4b5   : > { %3739 = vmatmul.mubr.msk.f32.vlgmr.msra.gmra.mxu1 %vm1210_vm2, %v4105_v31  ;;  %v2055_v31 = vld [vmem:[#allocation10 + $0xf8] sm:$0xff] }
 0x4b6   : > { %3747 = vmatpush3.msra.mxu1 %v1711_v43  ;;  %1787 = vadd.xlane.f32.xlu0 %v1786_v45  ;;  %v1944_v43 = vld [vmem:[#allocation7 + $0x68] sm:$0xff] }
 0x4b7   : > { %3748 = vmatprep.mubr.msk.f32.mxu1 %vm4650_vm0, %v4649_v0  ;;  %3786 = vmatprep.subr.mxu1 %v4649_v0  ;;  %v2044_v45 = vld [vmem:[#allocation10 + $0xa0] sm:$0xff] }
 0x4b8   : > { %2068 = vmatprep.subr.mxu0 %v2055_v31 }
 0x4b9   : > { %3749 = vmatmul.mubr.msk.f32.vlgmr.msra.gmra.mxu1 %vm1210_vm2, %v4109_v42  ;;  %v2045_v42 = vld [vmem:[#allocation10 + $0xa8] sm:$0xff] }
 0x4ba   : > { %1291 = vadd.xlane.f32.xlu0 %v1290_v46  ;;  %3818 = vmatprep.mubr.msk.f32.mxu1 %vm4650_vm0, %v4649_v0  ;;  %v2043_v46 = vld [vmem:[#allocation10 + $0x98] sm:$0xff] }
 0x4bb   : > { %3787 = vmatpush3.msra.mxu1 %v1946_v39 }
 0x4bc   : > { %3788 = vmatprep.subr.mxu1 %v4649_v0 }
 0x4bd   : > { %3789 = vmatpush3.msra.mxu1 %v1945_v41  ;;  %v3507_v41 = vld [vmem:[#allocation9] ss:$0 sm:$0xff] }
 0x4be   : > { %3790 = vmatprep.subr.mxu1 %v4649_v0 }
 0x4bf   : > { %3791 = vmatpush3.msra.mxu1 %v1944_v43 }
 0x4c0   : > { %3792 = vmatprep.subr.mxu1 %v4649_v0 }
 0x4c1   : > { %3793 = vmatpush3.msra.mxu1 %v1943_v47 }
 0x4c2   : > { %3794 = vmatprep.subr.mxu1 %v4649_v0 }
 0x4d7   : > { %v1623_v61 = vpop.xlane.xlu1 %1622 }
 0x53b   : > { %v1458_v60 = vpop.xlane.xlu0 %1457 }
 0x53c   : > { %4110 = vrcp.f32 %v1458_v60  ;;  %v2032_v60 = vld [vmem:[#allocation10 + $0x40] sm:$0xff] }
 0x53d   : > { %4112 = vrcp.f32 %v1623_v61  ;;  %v2031_v61 = vld [vmem:[#allocation10 + $0x38] sm:$0xff] }
 0x53f   : > { %v1788_v1 = vpop.xlane.xlu0 %1787 }
 0x540   : > { %4114 = vrcp.f32 %v1788_v1 }
 0x543   : > { %v1292_v17 = vpop.xlane.xlu0 %1291 }
 0x544   : > { %4116 = vrcp.f32 %v1292_v17  ;;  %v1937_v17 = vld [vmem:[#allocation7 + $0x30] sm:$0xff] }
 0x549   : > { %v4111_v5 = vpop.eup %4110 }
 0x54a   : > { %v4113_v9 = vpop.eup %4112 }
 0x54d   : > { %v4115_v13 = vpop.eup %4114 }
 0x551   : > { %v4117_v18 = vpop.eup %4116 }
 0x552   : > { %v1294_v20 = vmul.f32 %v4117_v18, %v5069_v24  ;;  %v1936_v18 = vld [vmem:[#allocation7 + $0x28] sm:$0xff] }
 0x571   : > { %v1452_v6 = vpop.f32.mrf.mxu1 }
 0x572   : > { %v1460_v7 = vmul.f32 %v4111_v5, %v1452_v6  ;;  %v2028_v5 = vld [vmem:[#allocation10 + $0x20] sm:$0xff]  ;;  %v1942_v6 = vld [vmem:[#allocation7 + $0x58] sm:$0xff] }
 0x573   : > { %v3730_v8 = vpop.f32.mrf.mxu1  ;;  %3795 = vmatpush3.msra.mxu1 %v1942_v6 }
 0x574   : > { %1792 = vrot.lane.b32.xlu1 %v1460_v7, %s4653_s23  ;;  %v2027_v7 = vld [vmem:[#allocation10 + $0x18] sm:$0xff]  ;;  %v2026_v8 = vld [vmem:[#allocation10 + $0x10] sm:$0xff]  ;;  %3796 = vmatprep.subr.mxu1 %v4649_v0 }
 0x575   : > { %v1617_v10 = vpop.f32.mrf.mxu1 }
 0x576   : > { %v1625_v11 = vmul.f32 %v4113_v9, %v1617_v10  ;;  %v1941_v9 = vld [vmem:[#allocation7 + $0x50] sm:$0xff] }
 0x577   : > { %v3740_v12 = vpop.f32.mrf.mxu1  ;;  %v2025_v10 = vld [vmem:[#allocation10 + $0x8] sm:$0xff]  ;;  %3797 = vmatpush3.msra.mxu1 %v1941_v9 }
 0x578   : > { %1796 = vrot.lane.b32.xlu0 %v1625_v11, %s4652_s5  ;;  %v1940_v11 = vld [vmem:[#allocation7 + $0x48] sm:$0xff]  ;;  %3798 = vmatprep.subr.mxu1 %v4649_v0 }
 0x579   : > { %v1782_v14 = vpop.f32.mrf.mxu1  ;;  %v2024_v12 = vld [vmem:[#allocation10] sm:$0xff]  ;;  %3799 = vmatpush3.msra.mxu1 %v1940_v11 }
 0x57a   : > { %v1790_v15 = vmul.f32 %v4115_v13, %v1782_v14  ;;  %v925_v13 = vld [vmem:[%s919_s24] sm:$0xff]  ;;  %3800 = vmatprep.subr.mxu1 %v4649_v0 }
 0x57b   : > { %v3750_v16 = vpop.f32.mrf.mxu1  ;;  %v1939_v14 = vld [vmem:[#allocation7 + $0x40] sm:$0xff] }
 0x57c   : > { %1800 = vrot.lane.b32.xlu1 %v1790_v15, %s4651_s28  ;;  %v1938_v15 = vld [vmem:[#allocation7 + $0x38] sm:$0xff]  ;;  %v926_v16 = vld [vmem:[%s919_s24 + $0x8] sm:$0xff]  ;;  %3801 = vmatpush3.msra.mxu1 %v1939_v14 }
 0x57d   : > { %3802 = vmatprep.subr.mxu1 %v4649_v0 }
 0x57e   : > { %3803 = vmatpush3.msra.mxu1 %v1938_v15 }
 0x57f   : > { %3804 = vmatprep.subr.mxu1 %v4649_v0 }
 0x580   : > { %3805 = vmatpush3.msra.mxu1 %v1937_v17 }
 0x581   : > { %3806 = vmatprep.subr.mxu1 %v4649_v0 }
 0x582   : > { %3807 = vmatpush3.msra.mxu1 %v1936_v18 }
 0x583   : > { %3808 = vmatprep.subr.mxu1 %v4649_v0 }
 0x5e6   : > { %v1793_v19 = vpop.permute.xlu1 %1792 }
 0x5e7   : > { %v1803_v22 = vsel %vm1133_vm1, %v1294_v20, %v1793_v19  ;;  %v1935_v19 = vld [vmem:[#allocation7 + $0x20] sm:$0xff]  ;;  %v1934_v20 = vld [vmem:[#allocation7 + $0x18] sm:$0xff] }
 0x5e8   : > { %3809 = vmatpush3.msra.mxu1 %v1935_v19 }
 0x5e9   : > { %3810 = vmatprep.subr.mxu1 %v4649_v0 }
 0x5ea   : > { %v1797_v21 = vpop.permute.xlu0 %1796  ;;  %3811 = vmatpush3.msra.mxu1 %v1934_v20 }
 0x5eb   : > { %v1805_v23 = vsel %vm1804_vm3, %v1803_v22, %v1797_v21  ;;  %v1933_v21 = vld [vmem:[#allocation7 + $0x10] sm:$0xff]  ;;  %3812 = vmatprep.subr.mxu1 %v4649_v0  ;;  %v1932_v22 = vld [vmem:[#allocation7 + $0x8] sm:$0xff] }
 0x5ec   : > { %3813 = vmatpush3.msra.mxu1 %v1933_v21 }
 0x5ed   : > { %3814 = vmatprep.subr.mxu1 %v4649_v0 }
 0x5ee   : > { %v1801_v25 = vpop.permute.xlu1 %1800  ;;  %3815 = vmatpush3.msra.mxu1 %v1932_v22 }
 0x5ef   : > { %v1807_v26 = vsel %vm1806_vm4, %v1805_v23, %v1801_v25  ;;  %v1931_v23 = vld [vmem:[#allocation7] sm:$0xff]  ;;  %3816 = vmatprep.subr.mxu1 %v4649_v0 }
 0x5f0   : > { %3784 = vmatmul.mubr.f32.vlgmr.msra.gmra.mxu0 %v1807_v26  ;;  %3817 = vmatpush3.msra.mxu1 %v1931_v23 }
 0x5f1   : > { %2132 = vmatprep.mubr.f32.mxu0 %v4649_v0  ;;  %2069 = vmatpush1.msra.mxu0 %v2054_v32 }
 0x5f2   : > { %2070 = vmatprep.subr.mxu0 %v2053_v33  ;;  %3821 = vmatprep.subr.mxu1 %v4649_v0  ;;  %v2056_v33 = vld [vmem:[#allocation12] sm:$0x3] }
 0x5f3   : > { %2071 = vmatpush1.msra.mxu0 %v2052_v34  ;;  %v2065_v34 = vrot.slane %v2056_v33, %v5030_v54 }
 0x5f4   : > { %2072 = vmatprep.subr.mxu0 %v2051_v35 }
 0x5f5   : > { %2073 = vmatpush1.msra.mxu0 %v2050_v36  ;;  %v2061_v36 = vrot.slane %v2056_v33, %v5025_v52 }
 0x5f6   : > { %2074 = vmatprep.subr.mxu0 %v2049_v37 }
 0x5f7   : > { %2075 = vmatpush1.msra.mxu0 %v2048_v38 }
 0x6b0   : > { %v1890_v27 = vpop.f32.mrf.mxu0 }
 0x6b1   : > { %v1894_v24 = vadd.f32 %v1890_v27, %v5007_v44  ;;  %v2047_v44 = vld [vmem:[#allocation10 + $0xb8] sm:$0xff] }
 0x6b2   : > { %v3785_v29 = vpop.f32.mrf.mxu0  ;;  %2076 = vmatprep.subr.mxu0 %v2047_v44 }
 0x6b3   : > { %v5164_v30 = vadd.f32 %v3504_v28, %v1894_v24  ;;  %2077 = vmatpush1.msra.mxu0 %v2046_v40  ;;  %v3505_v24 = vld [vmem:[#allocation4] ss:$0 sm:$0xff] }
 0x6b4   : > { %2078 = vmatprep.subr.mxu0 %v2045_v42 }
 0x6b5   : > { %1903 = vadd.xlane.f32.xlu1 %v5164_v30  ;;  %2079 = vmatpush1.msra.mxu0 %v2044_v45 }
 0x6b6   : > { %2080 = vmatprep.subr.mxu0 %v2043_v46 }
 0x6b7   : > { %2081 = vmatpush1.msra.mxu0 %v2042_v48 }
 0x6b8   : > { %2082 = vmatprep.subr.mxu0 %v2041_v49 }
 0x6b9   : > { %2083 = vmatpush1.msra.mxu0 %v2040_v50 }
 0x6ba   : > { %2084 = vmatprep.subr.mxu0 %v2039_v51 }
 0x6bb   : > { %2085 = vmatpush1.msra.mxu0 %v2038_v53 }
 0x6bc   : > { %2086 = vmatprep.subr.mxu0 %v2037_v55 }
 0x6bd   : > { %2087 = vmatpush1.msra.mxu0 %v2036_v56 }
 0x6be   : > { %2088 = vmatprep.subr.mxu0 %v2035_v57 }
 0x6bf   : > { %2089 = vmatpush1.msra.mxu0 %v2034_v58 }
 0x6c0   : > { %2090 = vmatprep.subr.mxu0 %v2033_v59 }
 0x6c1   : > { %2091 = vmatpush1.msra.mxu0 %v2032_v60 }
 0x6c2   : > { %2092 = vmatprep.subr.mxu0 %v2031_v61 }
 0x6c3   : > { %2093 = vmatpush1.msra.mxu0 %v2030_v62 }
 0x6c4   : > { %2094 = vmatprep.subr.mxu0 %v2029_v4 }
 0x6c5   : > { %2095 = vmatpush1.msra.mxu0 %v2028_v5 }
 0x6c6   : > { %2096 = vmatprep.subr.mxu0 %v2027_v7 }
 0x6c7   : > { %2097 = vmatpush1.msra.mxu0 %v2026_v8 }
 0x6c8   : > { %2098 = vmatprep.subr.mxu0 %v2025_v10 }
 0x6c9   : > { %2099 = vmatpush1.msra.mxu0 %v2024_v12 }
 0x6ca   : > { %2133 = vmatmul.mubr.f32.vlgmr.msra.gmra.mxu0 %v925_v13  ;;  %3877 = vmatprep.subr.mxu0 %v4649_v0 }
 0x6cb   : > { %2138 = vmatprep.mubr.f32.mxu0 %v4649_v0 }
 0x6ce   : > { %2139 = vmatmul.mubr.f32.gmra.mxu0 %v926_v16 }
 0x6cf   : > { %3909 = vmatprep.mubr.msk.f32.mxu0 %vm4650_vm0, %v4649_v0 }
 0x73e   : > { %v1904_v63 = vpop.xlane.xlu1 %1903 }
 0x73f   : > { %v1906_v1 = vmul.f32 0.0078125, %v1904_v63 }
 0x741   : > { %v5172_v2 = vsub.f32 %v5164_v30, %v1906_v1  ;;  %v3506_v30 = vld [vmem:[#allocation6] ss:$0 sm:$0xff] }
 0x743   : > { %v1908_v3 = vmul.f32 %v5172_v2, %v5172_v2 }
 0x745   : > { %1909 = vadd.xlane.f32.xlu0 %v1908_v3 }
 0x78a   : > { %v2134_v35 = vpop.f32.mrf.mxu0 }
 0x78b   : > { %v2135_v40 = vadd.f32 %v2134_v35, %v2061_v36 }
 0x78c   : > { %v2136_v37 = vpop.f32.mrf.mxu0 }
 0x78d   : > { %v5204_v38 = vadd.f32 %v2136_v37, %v2065_v34 }
 0x78e   : > { %v2140_v44 = vpop.f32.mrf.mxu0 }
 0x78f   : > { %v2141_v39 = vadd.f32 %v2140_v44, %v2061_v36 }
 0x790   : > { %v2142_v42 = vpop.f32.mrf.mxu0 }
 0x791   : > { %2313 = vrot.lane.b32.xlu1 %v2141_v39, %s4651_s28  ;;  %v5211_v46 = vadd.f32 %v2142_v42, %v2065_v34 }
 0x7ce   : > { %v1910_v25 = vpop.xlane.xlu0 %1909 }
 0x7cf   : > { %v1911_v26 = vmul.f32 0.0078125, %v1910_v25 }
 0x7d1   : > { %v1912_v27 = vadd.f32 1e-05, %v1911_v26 }
 0x7d3   : > { %4118 = vrsqrt.f32 %v1912_v27 }
 0x7e0   : > { %v4119_v28 = vpop.eup %4118 }
 0x7e1   : > { %v1914_v29 = vmul.f32 %v4119_v28, %v5172_v2 }
 0x7e3   : > { %v1922_v31 = vmul.f32 %v3505_v24, %v1914_v29 }
 0x7e5   : > { %v5197_v32 = vadd.f32 %v3506_v30, %v1922_v31 }
 0x7e7   : > { %3819 = vmatmul.mubr.f32.vlgmr.msra.gmra.mxu1 %v5197_v32 }
 0x7e8   : > { %3825 = vmatprep.mubr.msk.f32.mxu1 %vm4650_vm0, %v4649_v0  ;;  %3822 = vmatpush3.xpose.msk.msra.mxu1 %vm1133_vm1, %v2141_v39 }
 0x7e9   : > { %3823 = vmatprep.subr.mxu1 %v4649_v0 }
 0x7ec   : > { %3824 = vmatpush3.xpose.msk.msra.mxu1 %vm1133_vm1, %v2135_v40 }
 0x7ed   : > { %3828 = vmatprep.subr.mxu1 %v4649_v0 }
 0x803   : > { %v2314_v58 = vpop.permute.xlu1 %2313 }
 0x8a7   : > { %v2020_v43 = vpop.f32.mrf.mxu1 }
 0x8a8   : > { %v2021_v45 = vadd.f32 %v3507_v41, %v2020_v43 }
 0x8a9   : > { %v3820_v47 = vpop.f32.mrf.mxu1 }
 0x8aa   : > { %2309 = vrot.lane.b32.xlu1 %v2021_v45, %s4651_s28  ;;  %3826 = vmatmul.mubr.msk.f32.vlgmr.msra.gmra.mxu1 %vm1133_vm1, %v2021_v45  ;;  %v2857_v47 = vld [vmem:[#allocation13 + $0x78] sm:$0xff] }
 0x8ab   : > { %3829 = vmatpush3.msra.mxu1 %v5211_v46  ;;  %3832 = vmatprep.mubr.msk.f32.mxu1 %vm4650_vm0, %v4649_v0 }
 0x8ac   : > { %3830 = vmatprep.subr.mxu1 %v4649_v0  ;;  %3878 = vmatpush3.msra.mxu0 %v2857_v47  ;;  %v2972_v47 = vld [vmem:[#allocation19 + $0x40] sm:$0xff] }
 0x8ad   : > { %3831 = vmatpush3.msra.mxu1 %v5204_v38  ;;  %3879 = vmatprep.subr.mxu0 %v4649_v0 }
 0x8ae   : > { %3835 = vmatprep.subr.mxu1 %v4649_v0 }
 0x91c   : > { %v2310_v60 = vpop.permute.xlu1 %2309 }
 0x96a   : > { %v2220_v48 = vpop.f32.mrf.mxu1 }
 0x96b   : > { %v2225_v49 = vsel %vm2224_vm5, %v2220_v48, -inf }
 0x96c   : > { %2226 = vmax.xlane.f32.xlu0 %v2225_v49  ;;  %v3827_v50 = vpop.f32.mrf.mxu1  ;;  %v2855_v49 = vld [vmem:[#allocation13 + $0x68] sm:$0xff] }
 0x96d   : > { %v2854_v50 = vld [vmem:[#allocation13 + $0x60] sm:$0xff] }
 0x982   : > { %2311 = vrot.lane.b32.xlu0 %v2135_v40, %s4651_s28 }
 0x986   : > { %2401 = vrot.lane.b32.xlu0 %v5211_v46, %s4651_s28 }
 0x98a   : > { %2399 = vrot.lane.b32.xlu0 %v5204_v38, %s4651_s28 }
 0x98e   : > { %2487 = vrot.lane.b32.xlu0 %v2141_v39, %s4652_s5 }
 0x992   : > { %2485 = vrot.lane.b32.xlu0 %v2135_v40, %s4652_s5 }
 0x996   : > { %2483 = vrot.lane.b32.xlu0 %v2021_v45, %s4652_s5 }
 0x9f5   : > { %v2227_v51 = vpop.xlane.xlu0 %2226 }
 0x9f6   : > { %v2228_v53 = vsub.f32 %v2220_v48, %v2227_v51  ;;  %v2856_v48 = vld [vmem:[#allocation13 + $0x70] sm:$0xff]  ;;  %v2853_v51 = vld [vmem:[#allocation13 + $0x58] sm:$0xff] }
 0x9f7   : > { %3880 = vmatpush3.msra.mxu0 %v2856_v48  ;;  %v2971_v48 = vld [vmem:[#allocation19 + $0x38] sm:$0xff] }
 0x9f8   : > { %v2229_v55 = vmul.f32 1.442695, %v2228_v53  ;;  %3881 = vmatprep.subr.mxu0 %v4649_v0  ;;  %v2852_v53 = vld [vmem:[#allocation13 + $0x50] sm:$0xff] }
 0x9f9   : > { %v2312_v56 = vpop.permute.xlu0 %2311  ;;  %3882 = vmatpush3.msra.mxu0 %v2855_v49  ;;  %v2970_v49 = vld [vmem:[#allocation19 + $0x30] sm:$0xff] }
 0x9fa   : > { %4120 = vpow2.f32 %v2229_v55  ;;  %3883 = vmatprep.subr.mxu0 %v4649_v0  ;;  %v2851_v55 = vld [vmem:[#allocation13 + $0x48] sm:$0xff] }
 0x9fb   : > { %3884 = vmatpush3.msra.mxu0 %v2854_v50  ;;  %v2969_v50 = vld [vmem:[#allocation19 + $0x28] sm:$0xff] }
 0x9fc   : > { %3885 = vmatprep.subr.mxu0 %v4649_v0 }
 0x9fd   : > { %v2402_v59 = vpop.permute.xlu0 %2401  ;;  %3886 = vmatpush3.msra.mxu0 %v2853_v51  ;;  %v2968_v51 = vld [vmem:[#allocation19 + $0x20] sm:$0xff] }
 0x9fe   : > { %3887 = vmatprep.subr.mxu0 %v4649_v0 }
 0x9ff   : > { %3888 = vmatpush3.msra.mxu0 %v2852_v53  ;;  %v2967_v53 = vld [vmem:[#allocation19 + $0x18] sm:$0xff] }
 0xa00   : > { %3889 = vmatprep.subr.mxu0 %v4649_v0 }
 0xa01   : > { %v2400_v61 = vpop.permute.xlu0 %2399  ;;  %3890 = vmatpush3.msra.mxu0 %v2851_v55  ;;  %v2966_v55 = vld [vmem:[#allocation19 + $0x10] sm:$0xff] }
 0xa02   : > { %3891 = vmatprep.subr.mxu0 %v4649_v0 }
 0xa05   : > { %v2488_v7 = vpop.permute.xlu0 %2487 }
 0xa07   : > { %v5230_v57 = vpop.eup %4120 }
 0xa08   : > { %3833 = vmatmul.mubr.msk.f32.vlgmr.msra.gmra.mxu1 %vm2224_vm5, %v5230_v57  ;;  %v2304_v43 = vsel %vm2224_vm5, %v5230_v57, 0.0  ;;  %v2849_v57 = vld [vmem:[#allocation13 + $0x38] sm:$0xff] }
 0xa09   : > { %3836 = vmatpush3.xpose.msk.msra.mxu1 %vm1133_vm1, %v2314_v58  ;;  %3839 = vmatprep.mubr.msk.f32.mxu1 %vm4650_vm0, %v4649_v0  ;;  %v2486_v9 = vpop.permute.xlu0 %2485  ;;  %v2848_v58 = vld [vmem:[#allocation13 + $0x30] sm:$0xff] }
 0xa0a   : > { %3837 = vmatprep.subr.mxu1 %v4649_v0 }
 0xa0d   : > { %3838 = vmatpush3.xpose.msk.msra.mxu1 %vm1133_vm1, %v2312_v56  ;;  %v2484_v10 = vpop.permute.xlu0 %2483  ;;  %v2850_v56 = vld [vmem:[#allocation13 + $0x40] sm:$0xff] }
 0xa0e   : > { %3842 = vmatprep.subr.mxu1 %v4649_v0  ;;  %3892 = vmatpush3.msra.mxu0 %v2850_v56  ;;  %v2965_v56 = vld [vmem:[#allocation19 + $0x8] sm:$0xff] }
 0xa0f   : > { %3893 = vmatprep.subr.mxu0 %v4649_v0 }
 0xa10   : > { %3840 = vmatmul.mubr.msk.f32.vlgmr.msra.gmra.mxu1 %vm1133_vm1, %v2310_v60  ;;  %3894 = vmatpush3.msra.mxu0 %v2849_v57  ;;  %v2846_v60 = vld [vmem:[#allocation13 + $0x20] sm:$0xff] }
 0xa11   : > { %3843 = vmatpush3.msra.mxu1 %v2402_v59  ;;  %3846 = vmatprep.mubr.msk.f32.mxu1 %vm4650_vm0, %v4649_v0  ;;  %v2847_v59 = vld [vmem:[#allocation13 + $0x28] sm:$0xff] }
 0xa12   : > { %3844 = vmatprep.subr.mxu1 %v4649_v0  ;;  %3895 = vmatprep.subr.mxu0 %v4649_v0  ;;  %v2964_v57 = vld [vmem:[#allocation19] sm:$0xff] }
 0xa13   : > { %3845 = vmatpush3.msra.mxu1 %v2400_v61  ;;  %3896 = vmatpush3.msra.mxu0 %v2848_v58  ;;  %v2845_v61 = vld [vmem:[#allocation13 + $0x18] sm:$0xff]  ;;  %v3112_v58 = vld [vmem:[#allocation22 + $0xf8] sm:$0xff] }
 0xa14   : > { %3849 = vmatprep.subr.mxu1 %v4649_v0  ;;  %3897 = vmatprep.subr.mxu0 %v4649_v0 }
 0xa15   : > { %3898 = vmatpush3.msra.mxu0 %v2847_v59  ;;  %v3096_v59 = vld [vmem:[#allocation22 + $0x78] sm:$0xff] }
 0xa16   : > { %3899 = vmatprep.subr.mxu0 %v4649_v0 }
 0xa17   : > { %3900 = vmatpush3.msra.mxu0 %v2846_v60  ;;  %v3111_v60 = vld [vmem:[#allocation22 + $0xf0] sm:$0xff] }
 0xa18   : > { %3901 = vmatprep.subr.mxu0 %v4649_v0 }
 0xa19   : > { %3902 = vmatpush3.msra.mxu0 %v2845_v61  ;;  %v3095_v61 = vld [vmem:[#allocation22 + $0x70] sm:$0xff] }
 0xa1a   : > { %3903 = vmatprep.subr.mxu0 %v4649_v0 }
 0xac8   : > { %v5245_v62 = vpop.f32.mrf.mxu1 }
 0xaca   : > { %v3834_v63 = vpop.f32.mrf.mxu1 }
 0xacb   : > { %v2844_v63 = vld [vmem:[#allocation13 + $0x10] sm:$0xff] }
 0xacc   : > { %3904 = vmatpush3.msra.mxu0 %v2844_v63  ;;  %v3110_v63 = vld [vmem:[#allocation22 + $0xe8] sm:$0xff] }
 0xacd   : > { %3905 = vmatprep.subr.mxu0 %v4649_v0 }
 0xad0   : > { %v2387_v1 = vpop.f32.mrf.mxu1 }
 0xad1   : > { %v2391_v2 = vsel %vm2224_vm5, %v2387_v1, -inf }
 0xad2   : > { %2392 = vmax.xlane.f32.xlu1 %v2391_v2  ;;  %v3841_v3 = vpop.f32.mrf.mxu1 }
 0xad3   : > { %v2842_v3 = vld [vmem:[#allocation13] sm:$0xff] }
 0xae3   : > { %2573 = vrot.lane.b32.xlu1 %v5211_v46, %s4652_s5 }
 0xae7   : > { %2659 = vrot.lane.b32.xlu1 %v2141_v39, %s4653_s23 }
 0xaeb   : > { %2657 = vrot.lane.b32.xlu1 %v2135_v40, %s4653_s23 }
 0xaef   : > { %2655 = vrot.lane.b32.xlu1 %v2021_v45, %s4653_s23 }
 0xb5b   : > { %v2393_v4 = vpop.xlane.xlu1 %2392 }
 0xb5c   : > { %v2394_v5 = vsub.f32 %v2387_v1, %v2393_v4  ;;  %v2843_v1 = vld [vmem:[#allocation13 + $0x8] sm:$0xff] }
 0xb5d   : > { %3906 = vmatpush3.msra.mxu0 %v2843_v1  ;;  %v3094_v1 = vld [vmem:[#allocation22 + $0x68] sm:$0xff] }
 0xb5e   : > { %v2395_v6 = vmul.f32 1.442695, %v2394_v5  ;;  %3907 = vmatprep.subr.mxu0 %v4649_v0 }
 0xb5f   : > { %v2574_v11 = vpop.permute.xlu1 %2573  ;;  %3908 = vmatpush3.msra.mxu0 %v2842_v3  ;;  %v3093_v3 = vld [vmem:[#allocation22 + $0x60] sm:$0xff] }
 0xb60   : > { %4122 = vpow2.f32 %v2395_v6  ;;  %3641 = vmatprep.subr.mxu0 %v3112_v58  ;;  %v3528_v58 = vld [vmem:[#allocation25] ss:$0 sm:$0xff] }
 0xb63   : > { %v2660_v22 = vpop.permute.xlu1 %2659 }
 0xb67   : > { %v2658_v25 = vpop.permute.xlu1 %2657 }
 0xb6b   : > { %v2656_v27 = vpop.permute.xlu1 %2655 }
 0xb6d   : > { %v4123_v8 = vpop.eup %4122 }
 0xb6e   : > { %3847 = vmatmul.mubr.msk.f32.vlgmr.msra.gmra.mxu1 %vm2224_vm5, %v4123_v8  ;;  %v2478_v17 = vsel %vm2224_vm5, %v4123_v8, 0.0 }
 0xb6f   : > { %3850 = vmatpush3.xpose.msk.msra.mxu1 %vm1133_vm1, %v2488_v7  ;;  %3853 = vmatprep.mubr.msk.f32.mxu1 %vm4650_vm0, %v4649_v0 }
 0xb70   : > { %3851 = vmatprep.subr.mxu1 %v4649_v0 }
 0xb73   : > { %3852 = vmatpush3.xpose.msk.msra.mxu1 %vm1133_vm1, %v2486_v9 }
 0xb74   : > { %3856 = vmatprep.subr.mxu1 %v4649_v0 }
 0xb76   : > { %3854 = vmatmul.mubr.msk.f32.vlgmr.msra.gmra.mxu1 %vm1133_vm1, %v2484_v10 }
 0xb77   : > { %3857 = vmatpush3.msra.mxu1 %v2574_v11  ;;  %3860 = vmatprep.mubr.msk.f32.mxu1 %vm4650_vm0, %v4649_v0 }
 0xb78   : > { %3858 = vmatprep.subr.mxu1 %v4649_v0 }
 0xc2e   : > { %v2474_v12 = vpop.f32.mrf.mxu1 }
 0xc30   : > { %v3848_v13 = vpop.f32.mrf.mxu1 }
 0xc36   : > { %v2561_v14 = vpop.f32.mrf.mxu1 }
 0xc37   : > { %v2565_v15 = vsel %vm2224_vm5, %v2561_v14, -inf }
 0xc38   : > { %2566 = vmax.xlane.f32.xlu0 %v2565_v15  ;;  %v3855_v16 = vpop.f32.mrf.mxu1 }
 0xc4e   : > { %2571 = vrot.lane.b32.xlu0 %v5204_v38, %s4652_s5 }
 0xc52   : > { %2745 = vrot.lane.b32.xlu0 %v5211_v46, %s4653_s23 }
 0xc56   : > { %2743 = vrot.lane.b32.xlu0 %v5204_v38, %s4653_s23 }
 0xc75   : > { %2479 = vadd.xlane.f32.xlu0 %v2478_v17  ;;  %v3524_v17 = vld [vmem:[#allocation15] ss:$0 sm:$0xff] }
 0xcc1   : > { %v2567_v18 = vpop.xlane.xlu0 %2566 }
 0xcc2   : > { %v2568_v19 = vsub.f32 %v2561_v14, %v2567_v18 }
 0xcc4   : > { %v2569_v20 = vmul.f32 1.442695, %v2568_v19 }
 0xcc5   : > { %v2572_v21 = vpop.permute.xlu0 %2571 }
 0xcc6   : > { %4124 = vpow2.f32 %v2569_v20  ;;  %3859 = vmatpush3.msra.mxu1 %v2572_v21  ;;  %v2995_v21 = vld [vmem:[#allocation19 + $0xf8] sm:$0xff] }
 0xcc7   : > { %3863 = vmatprep.subr.mxu1 %v4649_v0 }
 0xcc9   : > { %v2746_v26 = vpop.permute.xlu0 %2745 }
 0xccd   : > { %v2744_v28 = vpop.permute.xlu0 %2743 }
 0xcd3   : > { %v4125_v23 = vpop.eup %4124 }
 0xcd4   : > { %3861 = vmatmul.mubr.msk.f32.vlgmr.msra.gmra.mxu1 %vm2224_vm5, %v4125_v23  ;;  %v2650_v34 = vsel %vm2224_vm5, %v4125_v23, 0.0  ;;  %v2992_v23 = vld [vmem:[#allocation19 + $0xe0] sm:$0xff] }
 0xcd5   : > { %3864 = vmatpush3.xpose.msk.msra.mxu1 %vm1133_vm1, %v2660_v22  ;;  %3867 = vmatprep.mubr.msk.f32.mxu1 %vm4650_vm0, %v4649_v0  ;;  %v2994_v22 = vld [vmem:[#allocation19 + $0xf0] sm:$0xff] }
 0xcd6   : > { %3865 = vmatprep.subr.mxu1 %v4649_v0 }
 0xcd9   : > { %3866 = vmatpush3.xpose.msk.msra.mxu1 %vm1133_vm1, %v2658_v25  ;;  %v2991_v25 = vld [vmem:[#allocation19 + $0xd8] sm:$0xff] }
 0xcda   : > { %3870 = vmatprep.subr.mxu1 %v4649_v0 }
 0xcdc   : > { %3868 = vmatmul.mubr.msk.f32.vlgmr.msra.gmra.mxu1 %vm1133_vm1, %v2656_v27  ;;  %v2989_v27 = vld [vmem:[#allocation19 + $0xc8] sm:$0xff] }
 0xcdd   : > { %3871 = vmatpush3.msra.mxu1 %v2746_v26  ;;  %3874 = vmatprep.mubr.msk.f32.mxu1 %vm4650_vm0, %v4649_v0  ;;  %v2990_v26 = vld [vmem:[#allocation19 + $0xd0] sm:$0xff] }
 0xcde   : > { %3872 = vmatprep.subr.mxu1 %v4649_v0 }
 0xcdf   : > { %3873 = vmatpush3.msra.mxu1 %v2744_v28  ;;  %v2988_v28 = vld [vmem:[#allocation19 + $0xc0] sm:$0xff] }
 0xce0   : > { %3008 = vmatprep.subr.mxu1 %v2995_v21 }
 0xcfe   : > { %v2480_v41 = vpop.xlane.xlu0 %2479 }
 0xd94   : > { %v2646_v24 = vpop.f32.mrf.mxu1 }
 0xd96   : > { %v3862_v29 = vpop.f32.mrf.mxu1 }
 0xd9c   : > { %v2733_v30 = vpop.f32.mrf.mxu1 }
 0xd9d   : > { %v2737_v31 = vsel %vm2224_vm5, %v2733_v30, -inf }
 0xd9e   : > { %2738 = vmax.xlane.f32.xlu1 %v2737_v31  ;;  %v3869_v33 = vpop.f32.mrf.mxu1  ;;  %v2987_v31 = vld [vmem:[#allocation19 + $0xb8] sm:$0xff] }
 0xd9f   : > { %v2986_v33 = vld [vmem:[#allocation19 + $0xb0] sm:$0xff] }
 0xda2   : > { %2651 = vadd.xlane.f32.xlu1 %v2650_v34  ;;  %v2985_v34 = vld [vmem:[#allocation19 + $0xa8] sm:$0xff] }
 0xe27   : > { %v2739_v35 = vpop.xlane.xlu1 %2738 }
 0xe28   : > { %v2740_v36 = vsub.f32 %v2733_v30, %v2739_v35  ;;  %v2984_v35 = vld [vmem:[#allocation19 + $0xa0] sm:$0xff] }
 0xe2a   : > { %v2741_v37 = vmul.f32 1.442695, %v2740_v36  ;;  %v2983_v36 = vld [vmem:[#allocation19 + $0x98] sm:$0xff] }
 0xe2b   : > { %v2652_v38 = vpop.xlane.xlu1 %2651 }
 0xe2c   : > { %4126 = vpow2.f32 %v2741_v37  ;;  %v2982_v37 = vld [vmem:[#allocation19 + $0x90] sm:$0xff] }
 0xe2d   : > { %4128 = vrcp.f32 %v2652_v38  ;;  %v2981_v38 = vld [vmem:[#allocation19 + $0x88] sm:$0xff] }
 0xe2e   : > { %4130 = vrcp.f32 %v2480_v41  ;;  %v2977_v41 = vld [vmem:[#allocation19 + $0x68] sm:$0xff] }
 0xe39   : > { %v4127_v44 = vpop.eup %4126 }
 0xe3a   : > { %v4129_v39 = vpop.eup %4128  ;;  %3875 = vmatmul.mubr.msk.f32.vlgmr.msra.gmra.mxu1 %vm2224_vm5, %v4127_v44  ;;  %v2822_v40 = vsel %vm2224_vm5, %v4127_v44, 0.0  ;;  %v2980_v44 = vld [vmem:[#allocation19 + $0x80] sm:$0xff] }
 0xe3b   : > { %2823 = vadd.xlane.f32.xlu1 %v2822_v40  ;;  %v2654_v42 = vmul.f32 %v4129_v39, %v2646_v24  ;;  %3072 = vmatprep.mubr.f32.mxu1 %v4649_v0  ;;  %v4131_v45 = vpop.eup %4130  ;;  %v2979_v39 = vld [vmem:[#allocation19 + $0x78] sm:$0xff]  ;;  %v2978_v40 = vld [vmem:[#allocation19 + $0x70] sm:$0xff] }
 0xe3c   : > { %v2482_v46 = vmul.f32 %v4131_v45, %v2474_v12  ;;  %3009 = vmatpush1.msra.mxu1 %v2994_v22  ;;  %v2974_v45 = vld [vmem:[#allocation19 + $0x50] sm:$0xff] }
 0xe3d   : > { %2832 = vrot.lane.b32.xlu0 %v2654_v42, %s4652_s5  ;;  %v2976_v42 = vld [vmem:[#allocation19 + $0x60] sm:$0xff] }
 0xe3f   : > { %2305 = vadd.xlane.f32.xlu1 %v2304_v43  ;;  %v2975_v43 = vld [vmem:[#allocation19 + $0x58] sm:$0xff] }
 0xe50   : > { %2828 = vrot.lane.b32.xlu1 %v2482_v46, %s4653_s23  ;;  %v2973_v46 = vld [vmem:[#allocation19 + $0x48] sm:$0xff]  ;;  %s923_s23 = scalar_lea.vmem %s5351_s22, %s3488_s4 }
 0xeaf   : > { %v2833_v13 = vpop.permute.xlu0 %2832 }
 0xec4   : > { %v2824_v2 = vpop.xlane.xlu1 %2823 }
 0xec5   : > { %4132 = vrcp.f32 %v2824_v2  ;;  %v3109_v2 = vld [vmem:[#allocation22 + $0xe0] sm:$0xff] }
 0xec8   : > { %v2306_v8 = vpop.xlane.xlu1 %2305 }
 0xec9   : > { %4134 = vrcp.f32 %v2306_v8  ;;  %v3106_v8 = vld [vmem:[#allocation22 + $0xc8] sm:$0xff] }
 0xecc   : > { %v2829_v11 = vpop.permute.xlu1 %2828 }
 0xed2   : > { %v4133_v4 = vpop.eup %4132 }
 0xed6   : > { %v4135_v9 = vpop.eup %4134 }
 0xed7   : > { %v2308_v10 = vmul.f32 %v4135_v9, %v5245_v62  ;;  %v2993_v62 = vld [vmem:[#allocation19 + $0xe8] sm:$0xff] }
 0xed8   : > { %3010 = vmatprep.subr.mxu1 %v2993_v62  ;;  %v3090_v9 = vld [vmem:[#allocation22 + $0x48] sm:$0xff]  ;;  %v3525_v62 = vld [vmem:[#allocation16] ss:$0 sm:$0xff] }
 0xed9   : > { %v2839_v12 = vsel %vm1133_vm1, %v2308_v10, %v2829_v11  ;;  %3011 = vmatpush1.msra.mxu1 %v2992_v23  ;;  %v3105_v10 = vld [vmem:[#allocation22 + $0xc0] sm:$0xff] }
 0xeda   : > { %v2840_v0 = vsel %vm1804_vm3, %v2839_v12, %v2833_v13  ;;  %3012 = vmatprep.subr.mxu1 %v2991_v25  ;;  %v3089_v11 = vld [vmem:[#allocation22 + $0x40] sm:$0xff]  ;;  %v3104_v12 = vld [vmem:[#allocation22 + $0xb8] sm:$0xff] }
 0xedb   : > { %3013 = vmatpush1.msra.mxu1 %v2990_v26  ;;  %v3088_v13 = vld [vmem:[#allocation22 + $0x38] sm:$0xff] }
 0xedc   : > { %3014 = vmatprep.subr.mxu1 %v2989_v27  ;;  %v3526_v25 = vld [vmem:[#allocation18] ss:$0 sm:$0xff] }
 0xedd   : > { %3015 = vmatpush1.msra.mxu1 %v2988_v28  ;;  %v3100_v28 = vld [vmem:[#allocation22 + $0x98] sm:$0xff] }
 0xede   : > { %3016 = vmatprep.subr.mxu1 %v2987_v31  ;;  %v3098_v31 = vld [vmem:[#allocation22 + $0x88] sm:$0xff] }
 0xedf   : > { %3017 = vmatpush1.msra.mxu1 %v2986_v33  ;;  %v3082_v33 = vld [vmem:[#allocation22 + $0x8] sm:$0xff] }
 0xee0   : > { %3018 = vmatprep.subr.mxu1 %v2985_v34  ;;  %v3097_v34 = vld [vmem:[#allocation22 + $0x80] sm:$0xff] }
 0xee1   : > { %3019 = vmatpush1.msra.mxu1 %v2984_v35  ;;  %v3081_v35 = vld [vmem:[#allocation22] sm:$0xff] }
 0xee2   : > { %3020 = vmatprep.subr.mxu1 %v2983_v36 }
 0xee3   : > { %3021 = vmatpush1.msra.mxu1 %v2982_v37 }
 0xee4   : > { %3022 = vmatprep.subr.mxu1 %v2981_v38 }
 0xee5   : > { %3023 = vmatpush1.msra.mxu1 %v2980_v44 }
 0xee6   : > { %3024 = vmatprep.subr.mxu1 %v2979_v39 }
 0xee7   : > { %3025 = vmatpush1.msra.mxu1 %v2978_v40 }
 0xee8   : > { %3026 = vmatprep.subr.mxu1 %v2977_v41 }
 0xee9   : > { %3027 = vmatpush1.msra.mxu1 %v2976_v42 }
 0xeea   : > { %3028 = vmatprep.subr.mxu1 %v2975_v43 }
 0xeeb   : > { %3029 = vmatpush1.msra.mxu1 %v2974_v45 }
 0xeec   : > { %3030 = vmatprep.subr.mxu1 %v2973_v46 }
 0xeed   : > { %3031 = vmatpush1.msra.mxu1 %v2972_v47  ;;  %v3527_v47 = vld [vmem:[#allocation24] ss:$0 sm:$0xff] }
 0xeee   : > { %3032 = vmatprep.subr.mxu1 %v2971_v48 }
 0xeef   : > { %3033 = vmatpush1.msra.mxu1 %v2970_v49 }
 0xef0   : > { %3034 = vmatprep.subr.mxu1 %v2969_v50 }
 0xef1   : > { %3035 = vmatpush1.msra.mxu1 %v2968_v51 }
 0xef2   : > { %3036 = vmatprep.subr.mxu1 %v2967_v53 }
 0xef3   : > { %3037 = vmatpush1.msra.mxu1 %v2966_v55 }
 0xef4   : > { %3038 = vmatprep.subr.mxu1 %v2965_v56 }
 0xef5   : > { %3039 = vmatpush1.msra.mxu1 %v2964_v57 }
 0xefa   : > { %v2818_v5 = vpop.f32.mrf.mxu1 }
 0xefb   : > { %v2826_v6 = vmul.f32 %v4133_v4, %v2818_v5  ;;  %v3108_v4 = vld [vmem:[#allocation22 + $0xd8] sm:$0xff] }
 0xefc   : > { %v3876_v7 = vpop.f32.mrf.mxu1  ;;  %v3092_v5 = vld [vmem:[#allocation22 + $0x58] sm:$0xff] }
 0xefd   : > { %2836 = vrot.lane.b32.xlu1 %v2826_v6, %s4651_s28  ;;  %v3107_v6 = vld [vmem:[#allocation22 + $0xd0] sm:$0xff] }
 0xefe   : > { %v3091_v7 = vld [vmem:[#allocation22 + $0x50] sm:$0xff] }
 0xf6f   : > { %v2837_v14 = vpop.permute.xlu1 %2836 }
 0xf70   : > { %v2841_v15 = vsel %vm1806_vm4, %v2840_v0, %v2837_v14  ;;  %v3103_v0 = vld [vmem:[#allocation22 + $0xb0] sm:$0xff] }
 0xf71   : > { %3910 = vmatmul.mubr.f32.vlgmr.msra.gmra.mxu0 %v2841_v15  ;;  %v3087_v14 = vld [vmem:[#allocation22 + $0x30] sm:$0xff]  ;;  %v3102_v15 = vld [vmem:[#allocation22 + $0xa8] sm:$0xff] }
 0xf72   : > { %3642 = vmatpush3.msra.mxu0 %v3096_v59 }
 0xf73   : > { %3643 = vmatprep.subr.mxu0 %v3111_v60  ;;  %v3529_v60 = vld [vmem:[#allocation27] ss:$0 sm:$0xff] }
 0xf74   : > { %3644 = vmatpush3.msra.mxu0 %v3095_v61 }
 0xf75   : > { %3645 = vmatprep.subr.mxu0 %v3110_v63 }
 0xf76   : > { %3646 = vmatpush3.msra.mxu0 %v3094_v1 }
 0xf77   : > { %3647 = vmatprep.subr.mxu0 %v3109_v2 }
 0xf78   : > { %3648 = vmatpush3.msra.mxu0 %v3093_v3 }
 0xf79   : > { %3649 = vmatprep.subr.mxu0 %v3108_v4 }
 0xf7a   : > { %3650 = vmatpush3.msra.mxu0 %v3092_v5 }
 0xf7b   : > { %3651 = vmatprep.subr.mxu0 %v3107_v6 }
 0xf7c   : > { %3652 = vmatpush3.msra.mxu0 %v3091_v7 }
 0xf7d   : > { %3653 = vmatprep.subr.mxu0 %v3106_v8 }
 0xf7e   : > { %3654 = vmatpush3.msra.mxu0 %v3090_v9 }
 0xf7f   : > { %3655 = vmatprep.subr.mxu0 %v3105_v10 }
 0xf80   : > { %3656 = vmatpush3.msra.mxu0 %v3089_v11 }
 0xf81   : > { %3657 = vmatprep.subr.mxu0 %v3104_v12 }
 0xf82   : > { %3658 = vmatpush3.msra.mxu0 %v3088_v13 }
 0xf83   : > { %3659 = vmatprep.subr.mxu0 %v3103_v0 }
 0xf84   : > { %3660 = vmatpush3.msra.mxu0 %v3087_v14 }
 0xf85   : > { %3661 = vmatprep.subr.mxu0 %v3102_v15 }
0x1031   : > { %v2924_v16 = vpop.f32.mrf.mxu0 }
0x1032   : > { %v2928_v18 = vadd.f32 %v2924_v16, %v5197_v32  ;;  %v3086_v16 = vld [vmem:[#allocation22 + $0x28] sm:$0xff] }
0x1033   : > { %v3911_v19 = vpop.f32.mrf.mxu0  ;;  %3662 = vmatpush3.msra.mxu0 %v3086_v16 }
0x1034   : > { %v2936_v20 = vadd.f32 %v3524_v17, %v2928_v18  ;;  %v3101_v17 = vld [vmem:[#allocation22 + $0xa0] sm:$0xff] }
0x1035   : > { %v3085_v18 = vld [vmem:[#allocation22 + $0x20] sm:$0xff]  ;;  %3663 = vmatprep.subr.mxu0 %v3101_v17 }
0x1036   : > { %2937 = vadd.xlane.f32.xlu1 %v2936_v20  ;;  %3664 = vmatpush3.msra.mxu0 %v3085_v18 }
0x1037   : > { %3665 = vmatprep.subr.mxu0 %v3100_v28 }
0x10bf   : > { %v2938_v32 = vpop.xlane.xlu1 %2937 }
0x10c0   : > { %v2939_v24 = vmul.f32 0.0078125, %v2938_v32  ;;  %v3084_v32 = vld [vmem:[#allocation22 + $0x18] sm:$0xff] }
0x10c1   : > { %3666 = vmatpush3.msra.mxu0 %v3084_v32 }
0x10c2   : > { %v5314_v29 = vsub.f32 %v2936_v20, %v2939_v24  ;;  %v3099_v24 = vld [vmem:[#allocation22 + $0x90] sm:$0xff] }
0x10c3   : > { %3667 = vmatprep.subr.mxu0 %v3099_v24 }
0x10c4   : > { %v2941_v30 = vmul.f32 %v5314_v29, %v5314_v29 }
0x10c6   : > { %2942 = vadd.xlane.f32.xlu0 %v2941_v30  ;;  %v3083_v30 = vld [vmem:[#allocation22 + $0x10] sm:$0xff] }
0x10c7   : > { %3668 = vmatpush3.msra.mxu0 %v3083_v30 }
0x10c8   : > { %3669 = vmatprep.subr.mxu0 %v3098_v31 }
0x10c9   : > { %3670 = vmatpush3.msra.mxu0 %v3082_v33 }
0x10ca   : > { %3671 = vmatprep.subr.mxu0 %v3097_v34 }
0x10cb   : > { %3672 = vmatpush3.msra.mxu0 %v3081_v35 }
0x114f   : > { %v2943_v19 = vpop.xlane.xlu0 %2942 }
0x1150   : > { %v2944_v20 = vmul.f32 0.0078125, %v2943_v19 }
0x1152   : > { %v2945_v21 = vadd.f32 1e-05, %v2944_v20 }
0x1154   : > { %4136 = vrsqrt.f32 %v2945_v21 }
0x1161   : > { %v4137_v22 = vpop.eup %4136 }
0x1162   : > { %v2947_v23 = vmul.f32 %v4137_v22, %v5314_v29  ;;  %v2996_v29 = vld [vmem:[#allocation21] sm:$0x3] }
0x1163   : > { %v3001_v36 = vrot.slane %v2996_v29, %v5025_v52  ;;  %v3005_v37 = vrot.slane %v2996_v29, %v5030_v54 }
0x1164   : > { %v2955_v26 = vmul.f32 %v3525_v62, %v2947_v23 }
0x1166   : > { %v2963_v27 = vadd.f32 %v3526_v25, %v2955_v26 }
0x1168   : > { %3073 = vmatmul.mubr.f32.vlgmr.msra.gmra.mxu1 %v2963_v27 }
0x1228   : > { %v3074_v38 = vpop.f32.mrf.mxu1 }
0x1229   : > { %v3075_v44 = vadd.f32 %v3074_v38, %v3001_v36 }
0x122a   : > { %v3076_v39 = vpop.f32.mrf.mxu1 }
0x122b   : > { %v3077_v40 = vadd.f32 %v3076_v39, %v3005_v37  ;;  %v3079_v42 = vmax.f32 %v3075_v44, 0.0 }
0x122d   : > { %v3080_v41 = vmax.f32 %v3077_v40, 0.0 }
0x122f   : > { %3177 = vmatprep.mubr.f32.mxu0 %v3080_v41 }
0x1230   : > { %3178 = vmatmul.mubr.f32.vlgmr.msra.gmra.mxu0 %v3079_v42 }
0x12f0   : > { %v3673_v43 = vpop.f32.mrf.mxu0 }
0x12f2   : > { %v3674_v45 = vpop.f32.mrf.mxu0 }
0x12f3   : > { %v3675_v46 = vadd.f32 %v3674_v45, %v3673_v43 }
0x12f5   : > { %v3183_v48 = vadd.f32 %v3675_v46, %v2963_v27 }
0x12f7   : > { %v3191_v49 = vadd.f32 %v3527_v47, %v3183_v48 }
0x12f9   : > { %3192 = vadd.xlane.f32.xlu0 %v3191_v49 }
0x1382   : > { %v3193_v50 = vpop.xlane.xlu0 %3192 }
0x1383   : > { %v3194_v52 = vmul.f32 0.0078125, %v3193_v50 }
0x1385   : > { %v3195_v51 = vsub.f32 %v3191_v49, %v3194_v52 }
0x1387   : > { %v3196_v54 = vmul.f32 %v3195_v51, %v3195_v51 }
0x1389   : > { %3197 = vadd.xlane.f32.xlu1 %v3196_v54 }
0x1412   : > { %v3198_v53 = vpop.xlane.xlu1 %3197 }
0x1413   : > { %v3199_v55 = vmul.f32 0.0078125, %v3198_v53 }
0x1415   : > { %v3200_v56 = vadd.f32 1e-05, %v3199_v55 }
0x1417   : > { %4138 = vrsqrt.f32 %v3200_v56 }
0x1424   : > { %v4139_v57 = vpop.eup %4138 }
0x1425   : > { %v3202_v59 = vmul.f32 %v4139_v57, %v3195_v51 }
0x1427   : > { %v3210_v61 = vmul.f32 %v3528_v58, %v3202_v59 }
0x1429   : > { %v3218_v63 = vadd.f32 %v3529_v60, %v3210_v61 }
0x142b   : > { %3219 = vst [vmem:[%s923_s23] sm:$0xff] %v3218_v63 }
0x142c PF: > { %s41_s3 = sadd.s32 1, %s4624_s3  }
0x142d   : > { %p38_p5 = scmp.ge.s32.totalorder %s41_s3, 4  }
0x142f   :  { %40 = sbr.rel (!%p38_p5) target bundleno = 19 (0x13), region = 210 }
0x1434   :  { %3239 = vsyncpa [#allocation3], 1 }
0x1435   :  { %3241 = vsyncpa [#allocation3 + $0x1], 1 }
0x1436   :  { %3242 = vsyncpa [#allocation5], 1 }
0x1437   :  { %3243 = vsyncpa [#allocation8], 1 }
0x1438   :  { %3244 = vsyncpa [#allocation11], 1 }
0x1439   :  { %3245 = vsyncpa [#allocation14], 1 }
0x143a   :  { %3246 = vsyncpa [#allocation17], 1 }
0x143b   :  { %3247 = vsyncpa [#allocation20], 1 }
0x143c   :  { %3248 = vsyncpa [#allocation23], 1 }
0x143d   :  { %3249 = vsyncpa [#allocation26], 1 }

</bundles_post_ra>
